<compile_context>
chip_gen: v6e
topology: v6e:2x2x1
jax: 0.10.0
libtpu: 0.0.40
codegen_flags: <defaults>
</compile_context>

<pallas_src>
import jax
import jax.numpy as jnp
from jax.experimental import pallas as pl
from jax.experimental.pallas import tpu as pltpu


def _rup(x, m):
    return ((x + m - 1) // m) * m


_LANE_TILE = 2048    # max lane tile over pooled output positions (conv kernels)
_BATCH_TILE = 1024   # max lane tile over batch for the fused (transposed) MLP kernel


def _lane_tiles(M, max_tile):
    """Pick (tile, padded_extent) for a lane axis of length M.

    Prefers >= 2 grid steps (so the "parallel" axis shards across v7x's two
    TensorCores) whenever the tile can stay a multiple of 128; tiny axes use a
    single full block (block == full array dims -> no padding at all)."""
    if M <= 128:
        return M, M
    tile = min(max_tile, _rup(pl.cdiv(M, 2), 128))
    return tile, _rup(M, tile)


# ----------------------------------------------------------------------------
# Pallas kernels
# ----------------------------------------------------------------------------
def _conv_pool_kernel(w_ref, b_ref, c0_ref, c1_ref, c2_ref, c3_ref, o_ref):
    """Fused conv + 2x2 max-pool + bias + ReLU for one lane tile of pooled positions.

    w: (OC, K) bf16, b: (OC, 1) f32, cq: (K, TM) bf16 = im2col^T for pool offset q,
    o: (OC, TM) bf16.  Max over the four raw f32 accumulators FIRST, then a single
    bias-add + ReLU + bf16 cast (exact by monotonicity)."""
    w = w_ref[...]

    def mm(c_ref):
        return jnp.dot(w, c_ref[...], preferred_element_type=jnp.float32)

    acc = jnp.maximum(jnp.maximum(mm(c0_ref), mm(c1_ref)),
                      jnp.maximum(mm(c2_ref), mm(c3_ref)))
    o_ref[...] = jnp.maximum(acc + b_ref[...], 0.0).astype(o_ref.dtype)


def _mlp_t_kernel(x_ref, w1_ref, b1_ref, w2_ref, b2_ref, w3_ref, b3_ref, o_ref):
    """Transposed fc1(ReLU) -> fc2(ReLU) -> fc3 on one batch lane-tile.

    x: (400, TN) bf16 = flat^T; wi: (out, in) bf16 (native PyTorch layout);
    bi: (out, 1) f32; o: (10, TN) f32 = logits^T.  Intermediates stay on-chip."""
    h = jnp.dot(w1_ref[...], x_ref[...], preferred_element_type=jnp.float32)
    h = jnp.maximum(h + b1_ref[...], 0.0)
    h = jnp.dot(w2_ref[...], h.astype(w2_ref.dtype), preferred_element_type=jnp.float32)
    h = jnp.maximum(h + b2_ref[...], 0.0)
    h = jnp.dot(w3_ref[...], h.astype(w3_ref.dtype), preferred_element_type=jnp.float32)
    o_ref[...] = (h + b3_ref[...]).astype(o_ref.dtype)


# ----------------------------------------------------------------------------
# Wrappers (host glue: im2col strided slices; all hot math is in-kernel)
# ----------------------------------------------------------------------------
def _pooled_im2col_T(x_chwn, KH, KW, PH, PW, di, dj):
    """Transposed im2col (CHWN layout) for pool-window offset (di, dj).

    Returns (IC*KH*KW, PH*PW*N) with
      colsT[ic*KH*KW + kh*KW + kw, (ph*PW + pw)*N + n]
        = x[ic, 2*ph + di + kh, 2*pw + dj + kw, n]
    """
    IC, H, W, N = x_chwn.shape
    parts = []
    for kh in range(KH):
        for kw in range(KW):
            parts.append(jax.lax.slice(
                x_chwn,
                (0, di + kh, dj + kw, 0),
                (IC, di + kh + 2 * PH - 1, dj + kw + 2 * PW - 1, N),
                (1, 2, 2, 1)))              # (IC, PH, PW, N)
    cols = jnp.stack(parts, axis=1)         # (IC, KH*KW, PH, PW, N)
    return cols.reshape(IC * KH * KW, PH * PW * N)


def conv_relu_pool_pallas(x_chwn, w_oihw, b):
    """maxpool2x2(relu(conv2d(x, w) + b)), VALID padding, stride 1.

    x: (IC, H, W, N) bf16 (CHWN).  Returns (OC, PH, PW, N) bf16 — the same producer
    layout, so it feeds the next conv / the flatten with no transpose."""
    OC, IC, KH, KW = w_oihw.shape
    C, H, W, N = x_chwn.shape
    assert C == IC
    OH, OW = H - KH + 1, W - KW + 1
    PH, PW = OH // 2, OW // 2
    K = IC * KH * KW
    M = PH * PW * N

    cols = [_pooled_im2col_T(x_chwn, KH, KW, PH, PW, di, dj)
            for di in (0, 1) for dj in (0, 1)]
    wm = w_oihw.reshape(OC, K).astype(jnp.bfloat16)
    bm = b.reshape(OC, 1).astype(jnp.float32)

    TM, Mp = _lane_tiles(M, _LANE_TILE)
    if Mp != M:
        # TODO(synk): a clamped index_map / in-kernel tail mask would avoid this pad
        # copy entirely; at the sizes where it triggers here it is negligible.
        cols = [jnp.pad(c, ((0, 0), (0, Mp - M))) for c in cols]

    cost = pl.CostEstimate(
        flops=2 * OC * K * Mp * 4,
        transcendentals=0,
        bytes_accessed=4 * K * Mp * 2 + OC * K * 2 + OC * 4 + OC * Mp * 2)
    out = pl.pallas_call(
        _conv_pool_kernel,
        out_shape=jax.ShapeDtypeStruct((OC, Mp), jnp.bfloat16),
        grid=(Mp // TM,),
        in_specs=[pl.BlockSpec((OC, K), lambda i: (0, 0)),
                  pl.BlockSpec((OC, 1), lambda i: (0, 0))]
                 + [pl.BlockSpec((K, TM), lambda i: (0, i))] * 4,
        out_specs=pl.BlockSpec((OC, TM), lambda i: (0, i)),
        compiler_params=pltpu.CompilerParams(dimension_semantics=("parallel",)),
        cost_estimate=cost,
    )(wm, bm, *cols)
    return out[:, :M].reshape(OC, PH, PW, N)


def mlp_t_pallas(x_t, w1, b1, w2, b2, w3, b3):
    """Fused, transposed MLP: relu(fc1) -> relu(fc2) -> fc3.

    x_t: (400, N) bf16 = flat^T; wi in native PyTorch (out, in) layout.
    Returns logits^T: (10, N) f32."""
    K, N = x_t.shape
    F1, F2, F3 = w1.shape[0], w2.shape[0], w3.shape[0]

    TN, Np = _lane_tiles(N, _BATCH_TILE)
    xp = x_t if Np == N else jnp.pad(x_t, ((0, 0), (0, Np - N)))
    xp = xp.astype(jnp.bfloat16)

    cost = pl.CostEstimate(
        flops=2 * (F1 * K + F2 * F1 + F3 * F2) * Np,
        transcendentals=0,
        bytes_accessed=K * Np * 2 + (F1 * K + F2 * F1 + F3 * F2) * 2
                       + (F1 + F2 + F3) * 4 + F3 * Np * 4)
    out = pl.pallas_call(
        _mlp_t_kernel,
        out_shape=jax.ShapeDtypeStruct((F3, Np), jnp.float32),
        grid=(Np // TN,),
        in_specs=[
            pl.BlockSpec((K, TN), lambda i: (0, i)),
            pl.BlockSpec((F1, K), lambda i: (0, 0)),
            pl.BlockSpec((F1, 1), lambda i: (0, 0)),
            pl.BlockSpec((F2, F1), lambda i: (0, 0)),
            pl.BlockSpec((F2, 1), lambda i: (0, 0)),
            pl.BlockSpec((F3, F2), lambda i: (0, 0)),
            pl.BlockSpec((F3, 1), lambda i: (0, 0)),
        ],
        out_specs=pl.BlockSpec((F3, TN), lambda i: (0, i)),
        compiler_params=pltpu.CompilerParams(dimension_semantics=("parallel",)),
        cost_estimate=cost,
    )(
        xp,
        w1.astype(jnp.bfloat16), b1.reshape(F1, 1).astype(jnp.float32),
        w2.astype(jnp.bfloat16), b2.reshape(F2, 1).astype(jnp.float32),
        w3.astype(jnp.bfloat16), b3.reshape(F3, 1).astype(jnp.float32),
    )
    return out[:, :N]


# ----------------------------------------------------------------------------
# The Net forward pass
# ----------------------------------------------------------------------------
def init_params(key):
    ks = jax.random.split(key, 10)

    def u(k, shape, fan_in):
        bound = 1.0 / jnp.sqrt(fan_in)
        return jax.random.uniform(k, shape, jnp.float32, -bound, bound)

    return {
        # All weights in native PyTorch layouts: conv (OC, IC, KH, KW), fc (out, in).
        "conv1_w": u(ks[0], (6, 3, 5, 5), 3 * 5 * 5),
        "conv1_b": u(ks[1], (6,), 3 * 5 * 5),
        "conv2_w": u(ks[2], (16, 6, 5, 5), 6 * 5 * 5),
        "conv2_b": u(ks[3], (16,), 6 * 5 * 5),
        "fc1_w": u(ks[4], (120, 16 * 5 * 5), 16 * 5 * 5),
        "fc1_b": u(ks[5], (120,), 16 * 5 * 5),
        "fc2_w": u(ks[6], (84, 120), 120),
        "fc2_b": u(ks[7], (84,), 120),
        "fc3_w": u(ks[8], (10, 84), 84),
        "fc3_b": u(ks[9], (10,), 84),
    }


def net_forward(x_nchw, params):
    N = x_nchw.shape[0]
    # One-time relayout to channel-leading CHWN; every later hand-off is a pure reshape.
    x = x_nchw.astype(jnp.bfloat16).transpose(1, 2, 3, 0)                 # (3, 32, 32, N)
    y1 = conv_relu_pool_pallas(x, params["conv1_w"], params["conv1_b"])   # (6, 14, 14, N)
    y2 = conv_relu_pool_pallas(y1, params["conv2_w"], params["conv2_b"])  # (16, 5, 5, N)
    # torch.flatten(x, 1): per-sample (c, h, w) ordering == rows of flat^T, no transpose.
    flat_t = y2.reshape(16 * 5 * 5, N)                                    # (400, N)
    logits_t = mlp_t_pallas(flat_t,
                            params["fc1_w"], params["fc1_b"],
                            params["fc2_w"], params["fc2_b"],
                            params["fc3_w"], params["fc3_b"])             # (10, N)
    return logits_t.T                                                     # (N, 10)


# ----------------------------------------------------------------------------
# Pure-JAX f32 reference (for a tolerance check only)
# ----------------------------------------------------------------------------
def _reference_forward(x_nchw, params):
    x = x_nchw.astype(jnp.float32)

    def conv(x, w, b):
        y = jax.lax.conv_general_dilated(
            x, w, (1, 1), "VALID", dimension_numbers=("NCHW", "OIHW", "NCHW"))
        return jax.nn.relu(y + b.reshape(1, -1, 1, 1))

    def pool(x):
        n, c, h, w = x.shape
        return x.reshape(n, c, h // 2, 2, w // 2, 2).max(axis=(3, 5))

    x = pool(conv(x, params["conv1_w"], params["conv1_b"]))
    x = pool(conv(x, params["conv2_w"], params["conv2_b"]))
    x = x.reshape(x.shape[0], -1)
    x = jax.nn.relu(x @ params["fc1_w"].T + params["fc1_b"])
    x = jax.nn.relu(x @ params["fc2_w"].T + params["fc2_b"])
    return x @ params["fc3_w"].T + params["fc3_b"]


if __name__ == "__main__":
    key = jax.random.PRNGKey(0)
    k_params, k_x = jax.random.split(key)
    params = init_params(k_params)
    # The architecture implies 32x32 spatial input (16*5*5 flatten); batch=2.
    x = jax.random.normal(k_x, (2, 3, 32, 32), dtype=jnp.float32)

    out = jax.jit(net_forward)(x, params)
    out = jax.block_until_ready(out)

    assert out.shape == (2, 10) and out.dtype == jnp.float32
    assert bool(jnp.all(jnp.isfinite(out)))
    ref = _reference_forward(x, params)
    # bf16 MXU operands (f32 accumulation): allow bf16-level deviation from the f32 ref.
    tol = 0.05 + 0.05 * float(jnp.max(jnp.abs(ref)))
    err = float(jnp.max(jnp.abs(out - ref)))
    assert err < tol, (err, tol)
    print("KERNEL_OK")
</pallas_src>

<mosaic_0001>
module attributes {stable_mosaic.version = 11 : i64} {
  func.func @_conv_pool_kernel(%arg0: i32, %arg1: memref<6x75xbf16, #tpu.memory_space<vmem>>, %arg2: memref<6x1xf32, #tpu.memory_space<vmem>>, %arg3: memref<75x256xbf16, #tpu.memory_space<vmem>>, %arg4: memref<75x256xbf16, #tpu.memory_space<vmem>>, %arg5: memref<75x256xbf16, #tpu.memory_space<vmem>>, %arg6: memref<75x256xbf16, #tpu.memory_space<vmem>>, %arg7: memref<6x256xbf16, #tpu.memory_space<vmem>>) attributes {dimension_semantics = [#tpu.dimension_semantics<parallel>], iteration_bounds = array<i64: 2>, scalar_prefetch = 0 : i64, scratch_operands = 0 : i64, tpu.core_type = #tpu.core_type<tc>, window_params = [{pipeline_mode = #tpu.pipeline_mode<synchronous>, transform_indices = @transform_0, window_bounds = array<i64: 6, 75>}, {pipeline_mode = #tpu.pipeline_mode<synchronous>, transform_indices = @transform_1, window_bounds = array<i64: 6, 1>}, {transform_indices = @transform_2, window_bounds = array<i64: 75, 256>}, {transform_indices = @transform_3, window_bounds = array<i64: 75, 256>}, {transform_indices = @transform_4, window_bounds = array<i64: 75, 256>}, {transform_indices = @transform_5, window_bounds = array<i64: 75, 256>}, {transform_indices = @transform_6, window_bounds = array<i64: 6, 256>}]} {
    %c0 = arith.constant 0 : index
    %c0_0 = arith.constant 0 : index
    %0 = vector.load %arg1[%c0, %c0_0] : memref<6x75xbf16, #tpu.memory_space<vmem>>, vector<6x75xbf16>
    %c0_1 = arith.constant 0 : index
    %c0_2 = arith.constant 0 : index
    %1 = vector.load %arg3[%c0_1, %c0_2] : memref<75x256xbf16, #tpu.memory_space<vmem>>, vector<75x256xbf16>
    %cst = arith.constant dense<0.000000e+00> : vector<6x256xf32>
    %2 = tpu.matmul %0, %1, %cst {dimension_numbers = #tpu.dot_dimension_numbers<[1], [0], [0], [1], [0, 0, 1, 1], [], []>} : vector<6x75xbf16>, vector<75x256xbf16>, vector<6x256xf32> -> vector<6x256xf32>
    %c0_3 = arith.constant 0 : index
    %c0_4 = arith.constant 0 : index
    %3 = vector.load %arg4[%c0_3, %c0_4] : memref<75x256xbf16, #tpu.memory_space<vmem>>, vector<75x256xbf16>
    %cst_5 = arith.constant dense<0.000000e+00> : vector<6x256xf32>
    %4 = tpu.matmul %0, %3, %cst_5 {dimension_numbers = #tpu.dot_dimension_numbers<[1], [0], [0], [1], [0, 0, 1, 1], [], []>} : vector<6x75xbf16>, vector<75x256xbf16>, vector<6x256xf32> -> vector<6x256xf32>
    %5 = arith.maximumf %2, %4 : vector<6x256xf32>
    %c0_6 = arith.constant 0 : index
    %c0_7 = arith.constant 0 : index
    %6 = vector.load %arg5[%c0_6, %c0_7] : memref<75x256xbf16, #tpu.memory_space<vmem>>, vector<75x256xbf16>
    %cst_8 = arith.constant dense<0.000000e+00> : vector<6x256xf32>
    %7 = tpu.matmul %0, %6, %cst_8 {dimension_numbers = #tpu.dot_dimension_numbers<[1], [0], [0], [1], [0, 0, 1, 1], [], []>} : vector<6x75xbf16>, vector<75x256xbf16>, vector<6x256xf32> -> vector<6x256xf32>
    %c0_9 = arith.constant 0 : index
    %c0_10 = arith.constant 0 : index
    %8 = vector.load %arg6[%c0_9, %c0_10] : memref<75x256xbf16, #tpu.memory_space<vmem>>, vector<75x256xbf16>
    %cst_11 = arith.constant dense<0.000000e+00> : vector<6x256xf32>
    %9 = tpu.matmul %0, %8, %cst_11 {dimension_numbers = #tpu.dot_dimension_numbers<[1], [0], [0], [1], [0, 0, 1, 1], [], []>} : vector<6x75xbf16>, vector<75x256xbf16>, vector<6x256xf32> -> vector<6x256xf32>
    %10 = arith.maximumf %7, %9 : vector<6x256xf32>
    %11 = arith.maximumf %5, %10 : vector<6x256xf32>
    %c0_12 = arith.constant 0 : index
    %c0_13 = arith.constant 0 : index
    %12 = vector.load %arg2[%c0_12, %c0_13] : memref<6x1xf32, #tpu.memory_space<vmem>>, vector<6x1xf32>
    %13 = vector.broadcast %12 : vector<6x1xf32> to vector<6x256xf32>
    %14 = arith.addf %11, %13 : vector<6x256xf32>
    %cst_14 = arith.constant 0.000000e+00 : f32
    %15 = vector.broadcast %cst_14 : f32 to vector<6x256xf32>
    %16 = arith.maximumf %14, %15 : vector<6x256xf32>
    %17 = arith.truncf %16 : vector<6x256xf32> to vector<6x256xbf16>
    %c0_15 = arith.constant 0 : index
    %c0_16 = arith.constant 0 : index
    %18 = vector.load %arg7[%c0_15, %c0_16] : memref<6x256xbf16, #tpu.memory_space<vmem>>, vector<6x256xbf16>
    tpu.vector_store %arg7[%c0_15, %c0_16], %17 {strides = array<i32>} : memref<6x256xbf16, #tpu.memory_space<vmem>>, vector<6x256xbf16>,
    return
  }
  func.func @transform_0(%arg0: i32) -> (i32, i32) {
    %c0_i32 = arith.constant 0 : i32
    %c0_i32_0 = arith.constant 0 : i32
    %c0_i32_1 = arith.constant 0 : i32
    return %c0_i32, %c0_i32_0 : i32, i32
  }
  func.func @transform_1(%arg0: i32) -> (i32, i32) {
    %c0_i32 = arith.constant 0 : i32
    %c0_i32_0 = arith.constant 0 : i32
    %c0_i32_1 = arith.constant 0 : i32
    return %c0_i32, %c0_i32_0 : i32, i32
  }
  func.func @transform_2(%arg0: i32) -> (i32, i32) {
    %c0_i32 = arith.constant 0 : i32
    %c0_i32_0 = arith.constant 0 : i32
    return %c0_i32, %arg0 : i32, i32
  }
  func.func @transform_3(%arg0: i32) -> (i32, i32) {
    %c0_i32 = arith.constant 0 : i32
    %c0_i32_0 = arith.constant 0 : i32
    return %c0_i32, %arg0 : i32, i32
  }
  func.func @transform_4(%arg0: i32) -> (i32, i32) {
    %c0_i32 = arith.constant 0 : i32
    %c0_i32_0 = arith.constant 0 : i32
    return %c0_i32, %arg0 : i32, i32
  }
  func.func @transform_5(%arg0: i32) -> (i32, i32) {
    %c0_i32 = arith.constant 0 : i32
    %c0_i32_0 = arith.constant 0 : i32
    return %c0_i32, %arg0 : i32, i32
  }
  func.func @transform_6(%arg0: i32) -> (i32, i32) {
    %c0_i32 = arith.constant 0 : i32
    %c0_i32_0 = arith.constant 0 : i32
    return %c0_i32, %arg0 : i32, i32
  }
}

module attributes {stable_mosaic.version = 11 : i64} {
  func.func @_conv_pool_kernel(%arg0: i32, %arg1: memref<16x150xbf16, #tpu.memory_space<vmem>>, %arg2: memref<16x1xf32, #tpu.memory_space<vmem>>, %arg3: memref<150x50xbf16, #tpu.memory_space<vmem>>, %arg4: memref<150x50xbf16, #tpu.memory_space<vmem>>, %arg5: memref<150x50xbf16, #tpu.memory_space<vmem>>, %arg6: memref<150x50xbf16, #tpu.memory_space<vmem>>, %arg7: memref<16x50xbf16, #tpu.memory_space<vmem>>) attributes {dimension_semantics = [#tpu.dimension_semantics<parallel>], iteration_bounds = array<i64: 1>, scalar_prefetch = 0 : i64, scratch_operands = 0 : i64, tpu.core_type = #tpu.core_type<tc>, window_params = [{pipeline_mode = #tpu.pipeline_mode<synchronous>, transform_indices = @transform_0, window_bounds = array<i64: 16, 150>}, {pipeline_mode = #tpu.pipeline_mode<synchronous>, transform_indices = @transform_1, window_bounds = array<i64: 16, 1>}, {transform_indices = @transform_2, window_bounds = array<i64: 150, 50>}, {transform_indices = @transform_3, window_bounds = array<i64: 150, 50>}, {transform_indices = @transform_4, window_bounds = array<i64: 150, 50>}, {transform_indices = @transform_5, window_bounds = array<i64: 150, 50>}, {transform_indices = @transform_6, window_bounds = array<i64: 16, 50>}]} {
    %c0 = arith.constant 0 : index
    %c0_0 = arith.constant 0 : index
    %0 = vector.load %arg1[%c0, %c0_0] : memref<16x150xbf16, #tpu.memory_space<vmem>>, vector<16x150xbf16>
    %c0_1 = arith.constant 0 : index
    %c0_2 = arith.constant 0 : index
    %1 = vector.load %arg3[%c0_1, %c0_2] : memref<150x50xbf16, #tpu.memory_space<vmem>>, vector<150x50xbf16>
    %cst = arith.constant dense<0.000000e+00> : vector<16x50xf32>
    %2 = tpu.matmul %0, %1, %cst {dimension_numbers = #tpu.dot_dimension_numbers<[1], [0], [0], [1], [0, 0, 1, 1], [], []>} : vector<16x150xbf16>, vector<150x50xbf16>, vector<16x50xf32> -> vector<16x50xf32>
    %c0_3 = arith.constant 0 : index
    %c0_4 = arith.constant 0 : index
    %3 = vector.load %arg4[%c0_3, %c0_4] : memref<150x50xbf16, #tpu.memory_space<vmem>>, vector<150x50xbf16>
    %cst_5 = arith.constant dense<0.000000e+00> : vector<16x50xf32>
    %4 = tpu.matmul %0, %3, %cst_5 {dimension_numbers = #tpu.dot_dimension_numbers<[1], [0], [0], [1], [0, 0, 1, 1], [], []>} : vector<16x150xbf16>, vector<150x50xbf16>, vector<16x50xf32> -> vector<16x50xf32>
    %5 = arith.maximumf %2, %4 : vector<16x50xf32>
    %c0_6 = arith.constant 0 : index
    %c0_7 = arith.constant 0 : index
    %6 = vector.load %arg5[%c0_6, %c0_7] : memref<150x50xbf16, #tpu.memory_space<vmem>>, vector<150x50xbf16>
    %cst_8 = arith.constant dense<0.000000e+00> : vector<16x50xf32>
    %7 = tpu.matmul %0, %6, %cst_8 {dimension_numbers = #tpu.dot_dimension_numbers<[1], [0], [0], [1], [0, 0, 1, 1], [], []>} : vector<16x150xbf16>, vector<150x50xbf16>, vector<16x50xf32> -> vector<16x50xf32>
    %c0_9 = arith.constant 0 : index
    %c0_10 = arith.constant 0 : index
    %8 = vector.load %arg6[%c0_9, %c0_10] : memref<150x50xbf16, #tpu.memory_space<vmem>>, vector<150x50xbf16>
    %cst_11 = arith.constant dense<0.000000e+00> : vector<16x50xf32>
    %9 = tpu.matmul %0, %8, %cst_11 {dimension_numbers = #tpu.dot_dimension_numbers<[1], [0], [0], [1], [0, 0, 1, 1], [], []>} : vector<16x150xbf16>, vector<150x50xbf16>, vector<16x50xf32> -> vector<16x50xf32>
    %10 = arith.maximumf %7, %9 : vector<16x50xf32>
    %11 = arith.maximumf %5, %10 : vector<16x50xf32>
    %c0_12 = arith.constant 0 : index
    %c0_13 = arith.constant 0 : index
    %12 = vector.load %arg2[%c0_12, %c0_13] : memref<16x1xf32, #tpu.memory_space<vmem>>, vector<16x1xf32>
    %13 = vector.broadcast %12 : vector<16x1xf32> to vector<16x50xf32>
    %14 = arith.addf %11, %13 : vector<16x50xf32>
    %cst_14 = arith.constant 0.000000e+00 : f32
    %15 = vector.broadcast %cst_14 : f32 to vector<16x50xf32>
    %16 = arith.maximumf %14, %15 : vector<16x50xf32>
    %17 = arith.truncf %16 : vector<16x50xf32> to vector<16x50xbf16>
    %c0_15 = arith.constant 0 : index
    %c0_16 = arith.constant 0 : index
    %18 = vector.load %arg7[%c0_15, %c0_16] : memref<16x50xbf16, #tpu.memory_space<vmem>>, vector<16x50xbf16>
    tpu.vector_store %arg7[%c0_15, %c0_16], %17 {strides = array<i32>} : memref<16x50xbf16, #tpu.memory_space<vmem>>, vector<16x50xbf16>,
    return
  }
  func.func @transform_0(%arg0: i32) -> (i32, i32) {
    %c0_i32 = arith.constant 0 : i32
    %c0_i32_0 = arith.constant 0 : i32
    %c0_i32_1 = arith.constant 0 : i32
    return %c0_i32, %c0_i32_0 : i32, i32
  }
  func.func @transform_1(%arg0: i32) -> (i32, i32) {
    %c0_i32 = arith.constant 0 : i32
    %c0_i32_0 = arith.constant 0 : i32
    %c0_i32_1 = arith.constant 0 : i32
    return %c0_i32, %c0_i32_0 : i32, i32
  }
  func.func @transform_2(%arg0: i32) -> (i32, i32) {
    %c0_i32 = arith.constant 0 : i32
    %c0_i32_0 = arith.constant 0 : i32
    return %c0_i32, %arg0 : i32, i32
  }
  func.func @transform_3(%arg0: i32) -> (i32, i32) {
    %c0_i32 = arith.constant 0 : i32
    %c0_i32_0 = arith.constant 0 : i32
    return %c0_i32, %arg0 : i32, i32
  }
  func.func @transform_4(%arg0: i32) -> (i32, i32) {
    %c0_i32 = arith.constant 0 : i32
    %c0_i32_0 = arith.constant 0 : i32
    return %c0_i32, %arg0 : i32, i32
  }
  func.func @transform_5(%arg0: i32) -> (i32, i32) {
    %c0_i32 = arith.constant 0 : i32
    %c0_i32_0 = arith.constant 0 : i32
    return %c0_i32, %arg0 : i32, i32
  }
  func.func @transform_6(%arg0: i32) -> (i32, i32) {
    %c0_i32 = arith.constant 0 : i32
    %c0_i32_0 = arith.constant 0 : i32
    return %c0_i32, %arg0 : i32, i32
  }
}

module attributes {stable_mosaic.version = 11 : i64} {
  func.func @_mlp_t_kernel(%arg0: i32, %arg1: memref<400x2xbf16, #tpu.memory_space<vmem>>, %arg2: memref<120x400xbf16, #tpu.memory_space<vmem>>, %arg3: memref<120x1xf32, #tpu.memory_space<vmem>>, %arg4: memref<84x120xbf16, #tpu.memory_space<vmem>>, %arg5: memref<84x1xf32, #tpu.memory_space<vmem>>, %arg6: memref<10x84xbf16, #tpu.memory_space<vmem>>, %arg7: memref<10x1xf32, #tpu.memory_space<vmem>>, %arg8: memref<10x2xf32, #tpu.memory_space<vmem>>) attributes {dimension_semantics = [#tpu.dimension_semantics<parallel>], iteration_bounds = array<i64: 1>, scalar_prefetch = 0 : i64, scratch_operands = 0 : i64, tpu.core_type = #tpu.core_type<tc>, window_params = [{transform_indices = @transform_0, window_bounds = array<i64: 400, 2>}, {pipeline_mode = #tpu.pipeline_mode<synchronous>, transform_indices = @transform_1, window_bounds = array<i64: 120, 400>}, {pipeline_mode = #tpu.pipeline_mode<synchronous>, transform_indices = @transform_2, window_bounds = array<i64: 120, 1>}, {pipeline_mode = #tpu.pipeline_mode<synchronous>, transform_indices = @transform_3, window_bounds = array<i64: 84, 120>}, {pipeline_mode = #tpu.pipeline_mode<synchronous>, transform_indices = @transform_4, window_bounds = array<i64: 84, 1>}, {pipeline_mode = #tpu.pipeline_mode<synchronous>, transform_indices = @transform_5, window_bounds = array<i64: 10, 84>}, {pipeline_mode = #tpu.pipeline_mode<synchronous>, transform_indices = @transform_6, window_bounds = array<i64: 10, 1>}, {transform_indices = @transform_7, window_bounds = array<i64: 10, 2>}]} {
    %c0 = arith.constant 0 : index
    %c0_0 = arith.constant 0 : index
    %0 = vector.load %arg2[%c0, %c0_0] : memref<120x400xbf16, #tpu.memory_space<vmem>>, vector<120x400xbf16>
    %c0_1 = arith.constant 0 : index
    %c0_2 = arith.constant 0 : index
    %1 = vector.load %arg1[%c0_1, %c0_2] : memref<400x2xbf16, #tpu.memory_space<vmem>>, vector<400x2xbf16>
    %cst = arith.constant dense<0.000000e+00> : vector<120x2xf32>
    %2 = tpu.matmul %0, %1, %cst {dimension_numbers = #tpu.dot_dimension_numbers<[1], [0], [0], [1], [0, 0, 1, 1], [], []>} : vector<120x400xbf16>, vector<400x2xbf16>, vector<120x2xf32> -> vector<120x2xf32>
    %c0_3 = arith.constant 0 : index
    %c0_4 = arith.constant 0 : index
    %3 = vector.load %arg3[%c0_3, %c0_4] : memref<120x1xf32, #tpu.memory_space<vmem>>, vector<120x1xf32>
    %4 = vector.broadcast %3 : vector<120x1xf32> to vector<120x2xf32>
    %5 = arith.addf %2, %4 : vector<120x2xf32>
    %cst_5 = arith.constant 0.000000e+00 : f32
    %6 = vector.broadcast %cst_5 : f32 to vector<120x2xf32>
    %7 = arith.maximumf %5, %6 : vector<120x2xf32>
    %c0_6 = arith.constant 0 : index
    %c0_7 = arith.constant 0 : index
    %8 = vector.load %arg4[%c0_6, %c0_7] : memref<84x120xbf16, #tpu.memory_space<vmem>>, vector<84x120xbf16>
    %9 = arith.truncf %7 : vector<120x2xf32> to vector<120x2xbf16>
    %cst_8 = arith.constant dense<0.000000e+00> : vector<84x2xf32>
    %10 = tpu.matmul %8, %9, %cst_8 {dimension_numbers = #tpu.dot_dimension_numbers<[1], [0], [0], [1], [0, 0, 1, 1], [], []>} : vector<84x120xbf16>, vector<120x2xbf16>, vector<84x2xf32> -> vector<84x2xf32>
    %c0_9 = arith.constant 0 : index
    %c0_10 = arith.constant 0 : index
    %11 = vector.load %arg5[%c0_9, %c0_10] : memref<84x1xf32, #tpu.memory_space<vmem>>, vector<84x1xf32>
    %12 = vector.broadcast %11 : vector<84x1xf32> to vector<84x2xf32>
    %13 = arith.addf %10, %12 : vector<84x2xf32>
    %cst_11 = arith.constant 0.000000e+00 : f32
    %14 = vector.broadcast %cst_11 : f32 to vector<84x2xf32>
    %15 = arith.maximumf %13, %14 : vector<84x2xf32>
    %c0_12 = arith.constant 0 : index
    %c0_13 = arith.constant 0 : index
    %16 = vector.load %arg6[%c0_12, %c0_13] : memref<10x84xbf16, #tpu.memory_space<vmem>>, vector<10x84xbf16>
    %17 = arith.truncf %15 : vector<84x2xf32> to vector<84x2xbf16>
    %cst_14 = arith.constant dense<0.000000e+00> : vector<10x2xf32>
    %18 = tpu.matmul %16, %17, %cst_14 {dimension_numbers = #tpu.dot_dimension_numbers<[1], [0], [0], [1], [0, 0, 1, 1], [], []>} : vector<10x84xbf16>, vector<84x2xbf16>, vector<10x2xf32> -> vector<10x2xf32>
    %c0_15 = arith.constant 0 : index
    %c0_16 = arith.constant 0 : index
    %19 = vector.load %arg7[%c0_15, %c0_16] : memref<10x1xf32, #tpu.memory_space<vmem>>, vector<10x1xf32>
    %20 = vector.broadcast %19 : vector<10x1xf32> to vector<10x2xf32>
    %21 = arith.addf %18, %20 : vector<10x2xf32>
    %c0_17 = arith.constant 0 : index
    %c0_18 = arith.constant 0 : index
    %22 = vector.load %arg8[%c0_17, %c0_18] : memref<10x2xf32, #tpu.memory_space<vmem>>, vector<10x2xf32>
    tpu.vector_store %arg8[%c0_17, %c0_18], %21 {strides = array<i32>} : memref<10x2xf32, #tpu.memory_space<vmem>>, vector<10x2xf32>,
    return
  }
  func.func @transform_0(%arg0: i32) -> (i32, i32) {
    %c0_i32 = arith.constant 0 : i32
    %c0_i32_0 = arith.constant 0 : i32
    return %c0_i32, %arg0 : i32, i32
  }
  func.func @transform_1(%arg0: i32) -> (i32, i32) {
    %c0_i32 = arith.constant 0 : i32
    %c0_i32_0 = arith.constant 0 : i32
    %c0_i32_1 = arith.constant 0 : i32
    return %c0_i32, %c0_i32_0 : i32, i32
  }
  func.func @transform_2(%arg0: i32) -> (i32, i32) {
    %c0_i32 = arith.constant 0 : i32
    %c0_i32_0 = arith.constant 0 : i32
    %c0_i32_1 = arith.constant 0 : i32
    return %c0_i32, %c0_i32_0 : i32, i32
  }
  func.func @transform_3(%arg0: i32) -> (i32, i32) {
    %c0_i32 = arith.constant 0 : i32
    %c0_i32_0 = arith.constant 0 : i32
    %c0_i32_1 = arith.constant 0 : i32
    return %c0_i32, %c0_i32_0 : i32, i32
  }
  func.func @transform_4(%arg0: i32) -> (i32, i32) {
    %c0_i32 = arith.constant 0 : i32
    %c0_i32_0 = arith.constant 0 : i32
    %c0_i32_1 = arith.constant 0 : i32
    return %c0_i32, %c0_i32_0 : i32, i32
  }
  func.func @transform_5(%arg0: i32) -> (i32, i32) {
    %c0_i32 = arith.constant 0 : i32
    %c0_i32_0 = arith.constant 0 : i32
    %c0_i32_1 = arith.constant 0 : i32
    return %c0_i32, %c0_i32_0 : i32, i32
  }
  func.func @transform_6(%arg0: i32) -> (i32, i32) {
    %c0_i32 = arith.constant 0 : i32
    %c0_i32_0 = arith.constant 0 : i32
    %c0_i32_1 = arith.constant 0 : i32
    return %c0_i32, %c0_i32_0 : i32, i32
  }
  func.func @transform_7(%arg0: i32) -> (i32, i32) {
    %c0_i32 = arith.constant 0 : i32
    %c0_i32_0 = arith.constant 0 : i32
    return %c0_i32, %arg0 : i32, i32
  }
}

</mosaic_0001>

<bundles_post_ra>
// kernel: net_forward.3
= control target key start
LH: loop header
LB: loop body
LE: loop exit
PB: predicated region body
PF: predicated region fallthrough
CT: control target
= control target key end

     0   :  { %s1396_s21 = smov 0   ;;  %s1398_s22 = smov 0   ;;  %s1554_s0 = inlined_call_operand.vmem [shape: bf16[6,75], index: 0, kind: input, shape index: {}]   ;;  %s1555_s1 = inlined_call_operand.vmem [shape: f32[6,1], index: 1, kind: input, shape index: {}]   ;;  %s1556_s2 = inlined_call_operand.vmem [shape: bf16[75,512], index: 2, kind: input, shape index: {}]   ;;  %s1557_s3 = inlined_call_operand.vmem [shape: bf16[75,512], index: 3, kind: input, shape index: {}]   ;;  %s1558_s4 = inlined_call_operand.vmem [shape: bf16[75,512], index: 4, kind: input, shape index: {}]   ;;  %s1559_s5 = inlined_call_operand.vmem [shape: bf16[75,512], index: 5, kind: input, shape index: {}]   ;;  %s1560_s6 = inlined_call_operand.vmem [shape: bf16[6,512], index: 6, kind: output, shape index: {}]  }
   0x1   :  { %s1400_s23 = smov 0  }
   0x2 LB: > { %s1176_s24 = sadd.s32 4294967295, %s1357_s23   ;;  %s1413_s25 = sadd.s32 1, %s1357_s23   ;;  %s1357_s23 = sphi %s1400_s23, %s1564_s23   ;;  %s1353_s22 = sphi %s1398_s22, %s1563_s22   ;;  %s1349_s21 = sphi %s1396_s21, %s1562_s21  }
   0x3   : > { %s62_s26 = ssub.s32 %s1357_s23, %s1413_s25  ;;  %s65_s27 = sadd.s32 1, %s1353_s22 }
   0x4   : > { %p63_p0 = scmp.eq.s32.totalorder %s62_s26, 0  ;;  %p72_p1 = scmp.ne.s32.totalorder %s1353_s22, %s1349_s21 }
   0x5   : > { %p73_p2 = scmp.eq.s32.totalorder %s1357_s23, 0  ;;  %p1179_p4 = scmp.ge.s32.totalorder %s1357_s23, 2 }
   0x6   : > { %s1422_s28 = scalar_select %p63_p0, %s1353_s22, %s65_s27  }
   0x7   : > { %p1424_p3 = por %p73_p2, %p72_p1  ;;  %208 = sbr.rel (%p1179_p4) target bundleno = 48 (0x30), region = 24 }
   0xc   : > { %211 = sbr.rel (!%p1424_p3) target bundleno = 21 (0x15), region = 28  ;;  %s213_s30 = sand.u32 (%p1424_p3), 1, %s1353_s22  }
   0xd   : > { %s1238_s7 = sshll.u32 (%p1424_p3), %s1357_s23, 3  ;;  %s1243_s8 = smul.u32 (%p1424_p3), 80, %s213_s30 }
   0xe   : > { %s218_s11 = scalar_lea.vmem (%p1424_p3), %s1556_s2, %s1238_s7 }
   0xf   : > { %v265_v0 = vld [vmem:[%s218_s11] sm:$0xff] (%p1424_p3)  ;;  %v267_v1 = vld [vmem:[%s218_s11 + $0x10] sm:$0xff] (%p1424_p3)  ;;  %s215_s12 = scalar_lea.vmem (%p1424_p3), [#allocation2], %s1243_s8 }
  0x10   : > { %v269_v2 = vld [vmem:[%s218_s11 + $0x20] sm:$0xff] (%p1424_p3)  ;;  %v271_v3 = vld [vmem:[%s218_s11 + $0x30] sm:$0xff] (%p1424_p3)  ;;  %266 = vst [vmem:[%s215_s12] sm:$0xff] (%p1424_p3), %v265_v0  ;;  %268 = vst [vmem:[%s215_s12 + $0x8] sm:$0xff] (%p1424_p3), %v267_v1 }
  0x11   : > { %v273_v4 = vld [vmem:[%s218_s11 + $0x40] sm:$0xff]  ;;  %v275_v5 = vld [vmem:[%s218_s11 + $0x50] sm:$0xff]  ;;  %270 = vst [vmem:[%s215_s12 + $0x10] sm:$0xff] %v269_v2  ;;  %272 = vst [vmem:[%s215_s12 + $0x18] sm:$0xff] %v271_v3 }
  0x12   : > { %274 = vst [vmem:[%s215_s12 + $0x20] sm:$0xff] %v273_v4  ;;  %276 = vst [vmem:[%s215_s12 + $0x28] sm:$0xff] %v275_v5  ;;  %v277_v6 = vld [vmem:[%s218_s11 + $0x60] sm:$0xff]  ;;  %v279_v7 = vld [vmem:[%s218_s11 + $0x70] sm:$0xff] }
  0x13   : > { %v281_v8 = vld [vmem:[%s218_s11 + $0x80] sm:$0xff]  ;;  %278 = vst [vmem:[%s215_s12 + $0x30] sm:$0xff] %v277_v6  ;;  %280 = vst [vmem:[%s215_s12 + $0x38] sm:$0xff] %v279_v7  ;;  %v283_v9 = vld [vmem:[%s218_s11 + $0x90] sm:$0xff] }
  0x14   : > { %282 = vst [vmem:[%s215_s12 + $0x40] sm:$0xff] %v281_v8  ;;  %284 = vst [vmem:[%s215_s12 + $0x48] sm:$0xff] %v283_v9 }
  0x15 PF: > { %290 = sbr.rel (!%p1424_p3) target bundleno = 30 (0x1e), region = 66  ;;  %s292_s13 = sand.u32 (%p1424_p3), 1, %s1353_s22  }
  0x16   : > { %s1239_s14 = sshll.u32 (%p1424_p3), %s1357_s23, 3  ;;  %s1244_s15 = smul.u32 (%p1424_p3), 80, %s292_s13 }
  0x17   : > { %s297_s18 = scalar_lea.vmem (%p1424_p3), %s1557_s3, %s1239_s14 }
  0x18   : > { %v344_v10 = vld [vmem:[%s297_s18] sm:$0xff] (%p1424_p3)  ;;  %v346_v11 = vld [vmem:[%s297_s18 + $0x10] sm:$0xff] (%p1424_p3)  ;;  %s294_s19 = scalar_lea.vmem (%p1424_p3), [#allocation3], %s1244_s15 }
  0x19   : > { %v348_v12 = vld [vmem:[%s297_s18 + $0x20] sm:$0xff] (%p1424_p3)  ;;  %v350_v13 = vld [vmem:[%s297_s18 + $0x30] sm:$0xff] (%p1424_p3)  ;;  %345 = vst [vmem:[%s294_s19] sm:$0xff] (%p1424_p3), %v344_v10  ;;  %347 = vst [vmem:[%s294_s19 + $0x8] sm:$0xff] (%p1424_p3), %v346_v11 }
  0x1a   : > { %v352_v14 = vld [vmem:[%s297_s18 + $0x40] sm:$0xff]  ;;  %v354_v15 = vld [vmem:[%s297_s18 + $0x50] sm:$0xff]  ;;  %349 = vst [vmem:[%s294_s19 + $0x10] sm:$0xff] %v348_v12  ;;  %351 = vst [vmem:[%s294_s19 + $0x18] sm:$0xff] %v350_v13 }
  0x1b   : > { %353 = vst [vmem:[%s294_s19 + $0x20] sm:$0xff] %v352_v14  ;;  %355 = vst [vmem:[%s294_s19 + $0x28] sm:$0xff] %v354_v15  ;;  %v356_v16 = vld [vmem:[%s297_s18 + $0x60] sm:$0xff]  ;;  %v358_v17 = vld [vmem:[%s297_s18 + $0x70] sm:$0xff] }
  0x1c   : > { %v360_v18 = vld [vmem:[%s297_s18 + $0x80] sm:$0xff]  ;;  %357 = vst [vmem:[%s294_s19 + $0x30] sm:$0xff] %v356_v16  ;;  %359 = vst [vmem:[%s294_s19 + $0x38] sm:$0xff] %v358_v17  ;;  %v362_v19 = vld [vmem:[%s297_s18 + $0x90] sm:$0xff] }
  0x1d   : > { %361 = vst [vmem:[%s294_s19 + $0x40] sm:$0xff] %v360_v18  ;;  %363 = vst [vmem:[%s294_s19 + $0x48] sm:$0xff] %v362_v19 }
  0x1e PF: > { %369 = sbr.rel (!%p1424_p3) target bundleno = 39 (0x27), region = 104  ;;  %s371_s20 = sand.u32 (%p1424_p3), 1, %s1353_s22  }
  0x1f   : > { %s1240_s26 = sshll.u32 (%p1424_p3), %s1357_s23, 3  ;;  %s1245_s27 = smul.u32 (%p1424_p3), 80, %s371_s20 }
  0x20   : > { %s376_s8 = scalar_lea.vmem (%p1424_p3), %s1558_s4, %s1240_s26 }
  0x21   : > { %v423_v20 = vld [vmem:[%s376_s8] sm:$0xff] (%p1424_p3)  ;;  %v425_v21 = vld [vmem:[%s376_s8 + $0x10] sm:$0xff] (%p1424_p3)  ;;  %s373_s9 = scalar_lea.vmem (%p1424_p3), [#allocation4], %s1245_s27 }
  0x22   : > { %v427_v22 = vld [vmem:[%s376_s8 + $0x20] sm:$0xff] (%p1424_p3)  ;;  %v429_v23 = vld [vmem:[%s376_s8 + $0x30] sm:$0xff] (%p1424_p3)  ;;  %424 = vst [vmem:[%s373_s9] sm:$0xff] (%p1424_p3), %v423_v20  ;;  %426 = vst [vmem:[%s373_s9 + $0x8] sm:$0xff] (%p1424_p3), %v425_v21 }
  0x23   : > { %v431_v24 = vld [vmem:[%s376_s8 + $0x40] sm:$0xff]  ;;  %v433_v25 = vld [vmem:[%s376_s8 + $0x50] sm:$0xff]  ;;  %428 = vst [vmem:[%s373_s9 + $0x10] sm:$0xff] %v427_v22  ;;  %430 = vst [vmem:[%s373_s9 + $0x18] sm:$0xff] %v429_v23 }
  0x24   : > { %432 = vst [vmem:[%s373_s9 + $0x20] sm:$0xff] %v431_v24  ;;  %434 = vst [vmem:[%s373_s9 + $0x28] sm:$0xff] %v433_v25  ;;  %v435_v26 = vld [vmem:[%s376_s8 + $0x60] sm:$0xff]  ;;  %v437_v27 = vld [vmem:[%s376_s8 + $0x70] sm:$0xff] }
  0x25   : > { %v439_v28 = vld [vmem:[%s376_s8 + $0x80] sm:$0xff]  ;;  %436 = vst [vmem:[%s373_s9 + $0x30] sm:$0xff] %v435_v26  ;;  %438 = vst [vmem:[%s373_s9 + $0x38] sm:$0xff] %v437_v27  ;;  %v441_v29 = vld [vmem:[%s376_s8 + $0x90] sm:$0xff] }
  0x26   : > { %440 = vst [vmem:[%s373_s9 + $0x40] sm:$0xff] %v439_v28  ;;  %442 = vst [vmem:[%s373_s9 + $0x48] sm:$0xff] %v441_v29 }
  0x27 PF: > { %448 = sbr.rel (!%p1424_p3) target bundleno = 48 (0x30), region = 142  ;;  %s450_s10 = sand.u32 (%p1424_p3), 1, %s1353_s22  }
  0x28   : > { %s1241_s11 = sshll.u32 (%p1424_p3), %s1357_s23, 3  ;;  %s1246_s12 = smul.u32 (%p1424_p3), 80, %s450_s10 }
  0x29   : > { %s455_s15 = scalar_lea.vmem (%p1424_p3), %s1559_s5, %s1241_s11 }
  0x2a   : > { %v502_v30 = vld [vmem:[%s455_s15] sm:$0xff] (%p1424_p3)  ;;  %v504_v31 = vld [vmem:[%s455_s15 + $0x10] sm:$0xff] (%p1424_p3)  ;;  %s452_s16 = scalar_lea.vmem (%p1424_p3), [#allocation5], %s1246_s12 }
  0x2b   : > { %v506_v32 = vld [vmem:[%s455_s15 + $0x20] sm:$0xff] (%p1424_p3)  ;;  %v508_v33 = vld [vmem:[%s455_s15 + $0x30] sm:$0xff] (%p1424_p3)  ;;  %503 = vst [vmem:[%s452_s16] sm:$0xff] (%p1424_p3), %v502_v30  ;;  %505 = vst [vmem:[%s452_s16 + $0x8] sm:$0xff] (%p1424_p3), %v504_v31 }
  0x2c   : > { %v510_v34 = vld [vmem:[%s455_s15 + $0x40] sm:$0xff]  ;;  %v512_v35 = vld [vmem:[%s455_s15 + $0x50] sm:$0xff]  ;;  %507 = vst [vmem:[%s452_s16 + $0x10] sm:$0xff] %v506_v32  ;;  %509 = vst [vmem:[%s452_s16 + $0x18] sm:$0xff] %v508_v33 }
  0x2d   : > { %511 = vst [vmem:[%s452_s16 + $0x20] sm:$0xff] %v510_v34  ;;  %513 = vst [vmem:[%s452_s16 + $0x28] sm:$0xff] %v512_v35  ;;  %v514_v36 = vld [vmem:[%s455_s15 + $0x60] sm:$0xff]  ;;  %v516_v37 = vld [vmem:[%s455_s15 + $0x70] sm:$0xff] }
  0x2e   : > { %v518_v38 = vld [vmem:[%s455_s15 + $0x80] sm:$0xff]  ;;  %515 = vst [vmem:[%s452_s16 + $0x30] sm:$0xff] %v514_v36  ;;  %517 = vst [vmem:[%s452_s16 + $0x38] sm:$0xff] %v516_v37  ;;  %v520_v39 = vld [vmem:[%s455_s15 + $0x90] sm:$0xff] }
  0x2f   : > { %519 = vst [vmem:[%s452_s16 + $0x40] sm:$0xff] %v518_v38  ;;  %521 = vst [vmem:[%s452_s16 + $0x48] sm:$0xff] %v520_v39 }
  0x30 PF: > { %p1188_p5 = scmp.ge.s32.totalorder %s1357_s23, 1  ;;  %p526_p6 = scmp.lt.s32.totalorder %s1357_s23, 3 }
  0x32   : > { %p527_p7 = pnand %p1188_p5, %p526_p6 }
  0x33   : > { %s533_s29 = sand.u32 (!%p527_p7), 1, %s1349_s21   ;;  %s1189_s8 = sshll.u32 (!%p527_p7), %s1176_s24, 1 }
  0x34   : > { %530 = sbr.rel (%p527_p7) target bundleno = 309 (0x135), region = 180  ;;  %p600_p8 = scmp.lt.s32.totalorder (!%p527_p7), %s1189_s8, 3 }
  0x35   : > { %s1460_s17 = smul.u32 (!%p527_p7), 80, %s533_s29 }
  0x37   : > { %s1471_s21 = scalar_lea.vmem (!%p527_p7), [#allocation2], %s1460_s17  ;;  %s1475_s20 = scalar_lea.vmem (!%p527_p7), [#allocation3], %s1460_s17 }
  0x38   : > { %s1498_s26 = scalar_lea.vmem (!%p527_p7), [#allocation4], %s1460_s17  ;;  %s1502_s27 = scalar_lea.vmem (!%p527_p7), [#allocation5], %s1460_s17 }
  0x39   : > { %vm669_vm0 = vcmask 1044480   ;;  %vm670_vm1 = vcmask 1045504   ;;  %v1359_v40 = vmov 65535   ;;  %v1360_v42 = vmov 0   ;;  %v1041_v43 = vld [vmem:[%s1555_s1] sm:$0x3f] }
  0x3a   : > { %v671_v41 = vsel %vm669_vm0, 4294967295, %v1359_v40  ;;  %711 = vmatprep.mubr.bf16.mxu0 %v1360_v42  ;;  %816 = vmatprep.mubr.bf16.mxu1 %v1360_v42  ;;  %v1275_v45 = vld [vmem:[%s1471_s21 + $0x44] ss:$8 sps:$4 sm:$0x3f]   ;;  %v1281_v51 = vld [vmem:[%s1471_s21 + $0x34] ss:$8 sps:$4 sm:$0xff]  }
  0x3b   : > { %1274 = vset.pattern.permute.xlu0 %v1360_v42  ;;  %v1468_v44 = vsel %vm670_vm1, %v671_v41, 0  ;;  %v1277_v46 = vld [vmem:[%s1475_s20 + $0x44] ss:$8 sps:$4 sm:$0x3f]   ;;  %v1283_v54 = vld [vmem:[%s1475_s20 + $0x34] ss:$8 sps:$4 sm:$0xff]  }
  0x3c   : > { %1044 = vperm.xlu0 %1274, %v1041_v43   ;;  %v677_v47 = vand.u32 %v1275_v45, %v1468_v44  ;;  %v1279_v48 = vld [vmem:[%s1471_s21 + $0x40] ss:$8 sps:$4 sm:$0x3f]   ;;  %v782_v50 = vand.u32 %v1277_v46, %v1468_v44  ;;  %v1285_v55 = vld [vmem:[%s1471_s21 + $0x30] ss:$8 sps:$4 sm:$0xff]   ;;  %vm665_vm2 = vcmask 613376  }
  0x3d   : > { %v1280_v49 = vld [vmem:[%s1475_s20 + $0x40] ss:$8 sps:$4 sm:$0x3f]   ;;  %v674_v52 = vand.u32 %v1279_v48, %v1468_v44  ;;  %v1286_v56 = vld [vmem:[%s1475_s20 + $0x30] ss:$8 sps:$4 sm:$0xff]   ;;  %s1566_s8 = smov (!%p600_p8, %s1189_s8), 3 }
  0x3e   : > { %685 = vmatprep.subr.bf16.mxu0 %v677_v47  ;;  %v779_v53 = vand.u32 %v1280_v49, %v1468_v44  ;;  %790 = vmatprep.subr.bf16.mxu1 %v782_v50  ;;  %v1287_v57 = vld [vmem:[%s1471_s21 + $0x24] ss:$8 sps:$4 sm:$0xff]   ;;  %v1291_v59 = vld [vmem:[%s1471_s21 + $0x20] ss:$8 sps:$4 sm:$0xff]   ;;  %v1293_v61 = vld [vmem:[%s1471_s21 + $0x14] ss:$8 sps:$4 sm:$0xff]  }
  0x3f   : > { %686 = vmatpush1.bf16.msra.mxu0 %v674_v52  ;;  %v1289_v58 = vld [vmem:[%s1475_s20 + $0x24] ss:$8 sps:$4 sm:$0xff]   ;;  %v1292_v60 = vld [vmem:[%s1475_s20 + $0x20] ss:$8 sps:$4 sm:$0xff]   ;;  %v1295_v62 = vld [vmem:[%s1475_s20 + $0x14] ss:$8 sps:$4 sm:$0xff]  }
  0x40   : > { %791 = vmatpush1.bf16.msra.mxu1 %v779_v53  ;;  %687 = vmatprep.subr.bf16.mxu0 %v1281_v51  ;;  %v1297_v63 = vld [vmem:[%s1471_s21 + $0x10] ss:$8 sps:$4 sm:$0xff]   ;;  %v1299_v1 = vld [vmem:[%s1471_s21 + $0x4] ss:$8 sps:$4 sm:$0xff]   ;;  %v1303_v4 = vld [vmem:[%s1471_s21] ss:$8 sps:$4 sm:$0xff]  }
  0x41   : > { %792 = vmatprep.subr.bf16.mxu1 %v1283_v54  ;;  %v1298_v0 = vld [vmem:[%s1475_s20 + $0x10] ss:$8 sps:$4 sm:$0xff]   ;;  %v1301_v2 = vld [vmem:[%s1475_s20 + $0x4] ss:$8 sps:$4 sm:$0xff]   ;;  %v1304_v6 = vld [vmem:[%s1475_s20] ss:$8 sps:$4 sm:$0xff]  }
  0x42   : > { %v1307_v3 = vld [vmem:[%s1498_s26 + $0x44] ss:$8 sps:$4 sm:$0x3f]   ;;  %v1305_v7 = vld [vmem:[%s1498_s26 + $0x40] ss:$8 sps:$4 sm:$0x3f]  }
  0x43   : > { %688 = vmatpush1.bf16.msra.mxu0 %v1285_v55  ;;  %v1310_v5 = vld [vmem:[%s1502_s27 + $0x44] ss:$8 sps:$4 sm:$0x3f]   ;;  %v1308_v8 = vld [vmem:[%s1502_s27 + $0x40] ss:$8 sps:$4 sm:$0x3f]   ;;  %v889_v9 = vand.u32 %v1307_v3, %v1468_v44  ;;  %v886_v12 = vand.u32 %v1305_v7, %v1468_v44 }
  0x44   : > { %793 = vmatpush1.bf16.msra.mxu1 %v1286_v56  ;;  %689 = vmatprep.subr.bf16.mxu0 %v1287_v57  ;;  %v994_v10 = vand.u32 %v1310_v5, %v1468_v44  ;;  %v606_v11 = vld [vmem:[%s1554_s0] sm:$0x7]  ;;  %v991_v13 = vand.u32 %v1308_v8, %v1468_v44  ;;  %v1313_v14 = vld [vmem:[%s1498_s26 + $0x34] ss:$8 sps:$4 sm:$0xff]   ;;  %v1319_v18 = vld [vmem:[%s1498_s26 + $0x24] ss:$8 sps:$4 sm:$0xff]  }
  0x45   : > { %794 = vmatprep.subr.bf16.mxu1 %v1289_v58  ;;  %v1316_v15 = vld [vmem:[%s1502_s27 + $0x34] ss:$8 sps:$4 sm:$0xff]   ;;  %v1311_v16 = vld [vmem:[%s1498_s26 + $0x30] ss:$8 sps:$4 sm:$0xff]   ;;  %v1322_v19 = vld [vmem:[%s1502_s27 + $0x24] ss:$8 sps:$4 sm:$0xff]  }
  0x46   : > { %v1314_v17 = vld [vmem:[%s1502_s27 + $0x30] ss:$8 sps:$4 sm:$0xff]   ;;  %v1317_v20 = vld [vmem:[%s1498_s26 + $0x20] ss:$8 sps:$4 sm:$0xff]   ;;  %v1325_v22 = vld [vmem:[%s1498_s26 + $0x14] ss:$8 sps:$4 sm:$0xff]  }
  0x47   : > { %690 = vmatpush1.bf16.msra.mxu0 %v1291_v59  ;;  %v1320_v21 = vld [vmem:[%s1502_s27 + $0x20] ss:$8 sps:$4 sm:$0xff]   ;;  %v1328_v23 = vld [vmem:[%s1502_s27 + $0x14] ss:$8 sps:$4 sm:$0xff]   ;;  %v1323_v24 = vld [vmem:[%s1498_s26 + $0x10] ss:$8 sps:$4 sm:$0xff]  }
  0x48   : > { %795 = vmatpush1.bf16.msra.mxu1 %v1292_v60  ;;  %691 = vmatprep.subr.bf16.mxu0 %v1293_v61  ;;  %v1326_v25 = vld [vmem:[%s1502_s27 + $0x10] ss:$8 sps:$4 sm:$0xff]   ;;  %v1331_v26 = vld [vmem:[%s1498_s26 + $0x4] ss:$8 sps:$4 sm:$0xff]   ;;  %v1329_v28 = vld [vmem:[%s1498_s26] ss:$8 sps:$4 sm:$0xff]  }
  0x49   : > { %796 = vmatprep.subr.bf16.mxu1 %v1295_v62  ;;  %v1334_v27 = vld [vmem:[%s1502_s27 + $0x4] ss:$8 sps:$4 sm:$0xff]   ;;  %v1332_v29 = vld [vmem:[%s1502_s27] ss:$8 sps:$4 sm:$0xff]   ;;  %s1190_s23 = sshll.u32 %s1566_s8, 2 }
  0x4a   : > { %s603_s10 = scalar_lea.vmem %s1560_s6, %s1190_s23 }
  0x4b   : > { %692 = vmatpush1.bf16.msra.mxu0 %v1297_v63 }
  0x4c   : > { %797 = vmatpush1.bf16.msra.mxu1 %v1298_v0  ;;  %693 = vmatprep.subr.bf16.mxu0 %v1299_v1 }
  0x4d   : > { %798 = vmatprep.subr.bf16.mxu1 %v1301_v2 }
  0x4f   : > { %694 = vmatpush1.bf16.msra.mxu0 %v1303_v4 }
  0x50   : > { %799 = vmatpush1.bf16.msra.mxu1 %v1304_v6  ;;  %897 = vmatprep.subr.bf16.mxu0 %v889_v9 }
  0x51   : > { %1002 = vmatprep.subr.bf16.mxu1 %v994_v10 }
  0x52   : > { %1201 = vmatmul.mubr.msk.bf16.vlgmr.msra.gmra.mxu0 %vm665_vm2, %v606_v11 }
  0x53   : > { %1212 = vmatmul.mubr.msk.bf16.vlgmr.msra.gmra.mxu1 %vm665_vm2, %v606_v11  ;;  %898 = vmatpush1.bf16.msra.mxu0 %v886_v12 }
  0x54   : > { %1003 = vmatpush1.bf16.msra.mxu1 %v991_v13  ;;  %899 = vmatprep.subr.bf16.mxu0 %v1313_v14 }
  0x55   : > { %1004 = vmatprep.subr.bf16.mxu1 %v1316_v15  ;;  %923 = vmatprep.mubr.bf16.mxu0 %v1360_v42 }
  0x56   : > { %1028 = vmatprep.mubr.bf16.mxu1 %v1360_v42 }
  0x57   : > { %900 = vmatpush1.bf16.msra.mxu0 %v1311_v16 }
  0x58   : > { %1005 = vmatpush1.bf16.msra.mxu1 %v1314_v17  ;;  %901 = vmatprep.subr.bf16.mxu0 %v1319_v18 }
  0x59   : > { %1006 = vmatprep.subr.bf16.mxu1 %v1322_v19 }
  0x5b   : > { %902 = vmatpush1.bf16.msra.mxu0 %v1317_v20 }
  0x5c   : > { %1007 = vmatpush1.bf16.msra.mxu1 %v1320_v21  ;;  %903 = vmatprep.subr.bf16.mxu0 %v1325_v22 }
  0x5d   : > { %1008 = vmatprep.subr.bf16.mxu1 %v1328_v23 }
  0x5f   : > { %904 = vmatpush1.bf16.msra.mxu0 %v1323_v24 }
  0x60   : > { %1009 = vmatpush1.bf16.msra.mxu1 %v1326_v25  ;;  %905 = vmatprep.subr.bf16.mxu0 %v1331_v26 }
  0x61   : > { %1010 = vmatprep.subr.bf16.mxu1 %v1334_v27 }
  0x63   : > { %906 = vmatpush1.bf16.msra.mxu0 %v1329_v28 }
  0x64   : > { %1011 = vmatpush1.bf16.msra.mxu1 %v1332_v29 }
  0x66   : > { %1223 = vmatmul.mubr.msk.bf16.vlgmr.msra.gmra.mxu0 %vm665_vm2, %v606_v11 }
  0x67   : > { %1234 = vmatmul.mubr.msk.bf16.vlgmr.msra.gmra.mxu1 %vm665_vm2, %v606_v11 }
  0xb7   : > { %v1045_v42 = vpop.permute.xlu0 %1044 }
 0x112   : > { %v713_v30 = vpop.f32.mrf.mxu0 }
 0x113   : > { %v818_v31 = vpop.f32.mrf.mxu1 }
 0x114   : > { %v715_v32 = vpop.f32.mrf.mxu0  ;;  %v825_v40 = vmax.f32 %v713_v30, %v818_v31 }
 0x115   : > { %v820_v33 = vpop.f32.mrf.mxu1 }
 0x116   : > { %v717_v34 = vpop.f32.mrf.mxu0  ;;  %v826_v45 = vmax.f32 %v715_v32, %v820_v33 }
 0x117   : > { %v822_v35 = vpop.f32.mrf.mxu1 }
 0x118   : > { %v718_v36 = vpop.f32.mrf.mxu0 }
 0x119   : > { %v823_v37 = vpop.f32.mrf.mxu1 }
 0x126   : > { %v925_v38 = vpop.f32.mrf.mxu0 }
 0x127   : > { %v1030_v39 = vpop.f32.mrf.mxu1 }
 0x128   : > { %v1037_v41 = vmax.f32 %v925_v38, %v1030_v39  ;;  %v927_v43 = vpop.f32.mrf.mxu0 }
 0x129   : > { %v1032_v44 = vpop.f32.mrf.mxu1 }
 0x12a   : > { %v1038_v46 = vmax.f32 %v927_v43, %v1032_v44  ;;  %v1039_v47 = vmax.f32 %v825_v40, %v1037_v41  ;;  %v929_v48 = vpop.f32.mrf.mxu0 }
 0x12b   : > { %v1034_v49 = vpop.f32.mrf.mxu1 }
 0x12c   : > { %v1040_v50 = vmax.f32 %v826_v45, %v1038_v46  ;;  %v1047_v51 = vadd.f32 %v1045_v42, %v1039_v47  ;;  %v930_v52 = vpop.f32.mrf.mxu0 }
 0x12d   : > { %v1035_v53 = vpop.f32.mrf.mxu1 }
 0x12e   : > { %v1048_v54 = vadd.f32 %v1045_v42, %v1040_v50  ;;  %v1049_v55 = vmax.f32 %v1047_v51, 0.0 }
 0x130   : > { %v1050_v56 = vmax.f32 %v1048_v54, 0.0 }
 0x132   : > { %v1242_v57 = vpack.c.bf16 %v1050_v56, %v1049_v55 }
 0x134   : > { %1059 = vst [vmem:[%s603_s10] sm:$0x77] %v1242_v57 }
 0x135 PF: > { %p13_p9 = scmp.ge.s32.totalorder %s1413_s25, 4   ;;  %s1562_s21 = smov %s1353_s22 }
 0x136   : > { %s1563_s22 = smov %s1422_s28  ;;  %s1564_s23 = smov %s1413_s25 }
 0x137   :  { %15 = sbr.rel (!%p13_p9) target bundleno = 2 (0x2), region = 255 }

// kernel: net_forward.4
= control target key start
LH: loop header
LB: loop body
LE: loop exit
PB: predicated region body
PF: predicated region fallthrough
CT: control target
= control target key end

     0   :  { %v652_v0 = vmov 0   ;;  %vm111_vm0 = vcmask 179200   ;;  %vm115_vm1 = vcmask 1042432   ;;  %vm550_vm2 = vcmask 404480   ;;  %s881_s2 = inlined_call_operand.vmem [shape: bf16[150,50], index: 2, kind: input, shape index: {}]   ;;  %s882_s3 = inlined_call_operand.vmem [shape: bf16[150,50], index: 3, kind: input, shape index: {}]   ;;  %s883_s0 = inlined_call_operand.vmem [shape: bf16[16,150], index: 0, kind: input, shape index: {}]   ;;  %s884_s4 = inlined_call_operand.vmem [shape: bf16[150,50], index: 4, kind: input, shape index: {}]   ;;  %s885_s5 = inlined_call_operand.vmem [shape: bf16[150,50], index: 5, kind: input, shape index: {}]   ;;  %s886_s1 = inlined_call_operand.vmem [shape: f32[16,1], index: 1, kind: input, shape index: {}]   ;;  %s887_s6 = inlined_call_operand.vmem [shape: bf16[16,50], index: 6, kind: output, shape index: {}]  }
   0x1   :  { %119 = vmatprep.subr.bf16.mxu0 %v652_v0  ;;  %239 = vmatprep.subr.bf16.mxu1 %v652_v0  ;;  %v609_v1 = vld [vmem:[%s881_s2 + $0x38] sm:$0xff]   ;;  %v611_v3 = vld [vmem:[%s881_s2 + $0x30] sm:$0xff]   ;;  %v613_v5 = vld [vmem:[%s881_s2 + $0x28] sm:$0xff]  }
   0x2   :  { %v610_v2 = vld [vmem:[%s882_s3 + $0x38] sm:$0xff]   ;;  %608 = vset.pattern.permute.xlu0 %v652_v0  ;;  %120 = vmatpush1.bf16.msra.mxu0 %v609_v1  ;;  %v612_v4 = vld [vmem:[%s882_s3 + $0x30] sm:$0xff]   ;;  %v614_v6 = vld [vmem:[%s882_s3 + $0x28] sm:$0xff]  }
   0x3   :  { %240 = vmatpush1.bf16.msra.mxu1 %v610_v2  ;;  %121 = vmatprep.subr.bf16.mxu0 %v652_v0  ;;  %v615_v7 = vld [vmem:[%s881_s2 + $0x20] sm:$0xff]   ;;  %v617_v9 = vld [vmem:[%s881_s2 + $0x18] sm:$0xff]   ;;  %v619_v11 = vld [vmem:[%s881_s2 + $0x10] sm:$0xff]  }
   0x4   :  { %241 = vmatprep.subr.bf16.mxu1 %v652_v0  ;;  %v616_v8 = vld [vmem:[%s882_s3 + $0x20] sm:$0xff]   ;;  %v618_v10 = vld [vmem:[%s882_s3 + $0x18] sm:$0xff]   ;;  %v620_v12 = vld [vmem:[%s882_s3 + $0x10] sm:$0xff]  }
   0x5   :  { %v629_v13 = vld [vmem:[%s883_s0 + $0x4] ss:$8 sps:$4 sm:$0xff]   ;;  %v625_v16 = vld [vmem:[%s881_s2 + $0x48] ss:$0 sps:$4 sm:$0x77]   ;;  %v632_v25 = vld [vmem:[%s884_s4 + $0x38] sm:$0xff]  }
   0x6   :  { %122 = vmatpush1.bf16.msra.mxu0 %v611_v3  ;;  %v621_v14 = vld [vmem:[%s881_s2 + $0x8] sm:$0xff]   ;;  %569 = vmatprep.mubr.msk.bf16.mxu0 %vm111_vm0, %v629_v13  ;;  %v623_v17 = vld [vmem:[%s881_s2] sm:$0xff]   ;;  %v117_v20 = vsel %vm115_vm1, %v625_v16, 0  ;;  %v633_v26 = vld [vmem:[%s885_s5 + $0x38] sm:$0xff]  }
   0x7   :  { %242 = vmatpush1.bf16.msra.mxu1 %v612_v4  ;;  %123 = vmatprep.subr.bf16.mxu0 %v652_v0  ;;  %v622_v15 = vld [vmem:[%s882_s3 + $0x8] sm:$0xff]   ;;  %v624_v19 = vld [vmem:[%s882_s3] sm:$0xff]   ;;  %v634_v28 = vld [vmem:[%s884_s4 + $0x30] sm:$0xff]  }
   0x8   :  { %243 = vmatprep.subr.bf16.mxu1 %v652_v0  ;;  %580 = vmatprep.mubr.msk.bf16.mxu1 %vm111_vm0, %v629_v13  ;;  %v626_v18 = vld [vmem:[%s882_s3 + $0x48] ss:$0 sps:$4 sm:$0x77]   ;;  %v627_v22 = vld [vmem:[%s881_s2 + $0x40] sm:$0xff]   ;;  %v635_v30 = vld [vmem:[%s885_s5 + $0x30] sm:$0xff]  }
   0x9   :  { %v237_v21 = vsel %vm115_vm1, %v626_v18, 0  ;;  %v628_v23 = vld [vmem:[%s882_s3 + $0x40] sm:$0xff]   ;;  %v527_v29 = vld [vmem:[%s886_s1 + $0x8] sm:$0xff]  ;;  %v640_v35 = vld [vmem:[%s884_s4 + $0x18] sm:$0xff]  }
   0xa   :  { %124 = vmatpush1.bf16.msra.mxu0 %v613_v5  ;;  %v779_v24 = vld [vmem:[%s883_s0] ss:$8 sps:$4 sm:$0xff]   ;;  %v641_v36 = vld [vmem:[%s885_s5 + $0x18] sm:$0xff]   ;;  %v642_v37 = vld [vmem:[%s884_s4 + $0x10] sm:$0xff]  }
   0xb   :  { %244 = vmatpush1.bf16.msra.mxu1 %v614_v6  ;;  %125 = vmatprep.subr.bf16.mxu0 %v652_v0  ;;  %v526_v27 = vld [vmem:[%s886_s1] sm:$0xff]  ;;  %v636_v31 = vld [vmem:[%s884_s4 + $0x28] sm:$0xff]   ;;  %v643_v38 = vld [vmem:[%s885_s5 + $0x10] sm:$0xff]  }
   0xc   :  { %245 = vmatprep.subr.bf16.mxu1 %v652_v0  ;;  %530 = vperm.xlu0 %608, %v526_v27   ;;  %v637_v32 = vld [vmem:[%s885_s5 + $0x28] sm:$0xff]   ;;  %v638_v33 = vld [vmem:[%s884_s4 + $0x20] sm:$0xff]  }
   0xd   :  { %v639_v34 = vld [vmem:[%s885_s5 + $0x20] sm:$0xff]   ;;  %v644_v39 = vld [vmem:[%s884_s4 + $0x8] sm:$0xff]  }
   0xe   :  { %126 = vmatpush1.bf16.msra.mxu0 %v615_v7  ;;  %v645_v40 = vld [vmem:[%s885_s5 + $0x8] sm:$0xff]   ;;  %v646_v41 = vld [vmem:[%s884_s4] sm:$0xff]  }
   0xf   :  { %246 = vmatpush1.bf16.msra.mxu1 %v616_v8  ;;  %127 = vmatprep.subr.bf16.mxu0 %v652_v0  ;;  %v647_v42 = vld [vmem:[%s885_s5] sm:$0xff]   ;;  %v648_v43 = vld [vmem:[%s884_s4 + $0x48] ss:$0 sps:$4 sm:$0x77]  }
  0x10   :  { %247 = vmatprep.subr.bf16.mxu1 %v652_v0  ;;  %535 = vperm.xlu0 %608, %v527_v29   ;;  %v649_v44 = vld [vmem:[%s885_s5 + $0x48] ss:$0 sps:$4 sm:$0x77]   ;;  %v359_v45 = vsel %vm115_vm1, %v648_v43, 0  ;;  %v650_v47 = vld [vmem:[%s884_s4 + $0x40] sm:$0xff]  }
  0x11   :  { %v479_v46 = vsel %vm115_vm1, %v649_v44, 0  ;;  %v651_v48 = vld [vmem:[%s885_s5 + $0x40] sm:$0xff]  }
  0x12   :  { %128 = vmatpush1.bf16.msra.mxu0 %v617_v9 }
  0x13   :  { %248 = vmatpush1.bf16.msra.mxu1 %v618_v10  ;;  %129 = vmatprep.subr.bf16.mxu0 %v652_v0 }
  0x14   :  { %249 = vmatprep.subr.bf16.mxu1 %v652_v0 }
  0x16   :  { %130 = vmatpush1.bf16.msra.mxu0 %v619_v11 }
  0x17   :  { %250 = vmatpush1.bf16.msra.mxu1 %v620_v12  ;;  %131 = vmatprep.subr.bf16.mxu0 %v652_v0 }
  0x18   :  { %251 = vmatprep.subr.bf16.mxu1 %v652_v0 }
  0x1a   :  { %132 = vmatpush1.bf16.msra.mxu0 %v621_v14 }
  0x1b   :  { %252 = vmatpush1.bf16.msra.mxu1 %v622_v15  ;;  %133 = vmatprep.subr.bf16.mxu0 %v652_v0 }
  0x1c   :  { %253 = vmatprep.subr.bf16.mxu1 %v652_v0 }
  0x1e   :  { %134 = vmatpush1.bf16.msra.mxu0 %v623_v17 }
  0x1f   :  { %254 = vmatpush1.bf16.msra.mxu1 %v624_v19  ;;  %147 = vmatprep.subr.bf16.mxu0 %v652_v0 }
  0x20   :  { %267 = vmatprep.subr.bf16.mxu1 %v652_v0 }
  0x22   :  { %148 = vmatpush2.bf16.msra.mxu0 %v117_v20 }
  0x23   :  { %268 = vmatpush2.bf16.msra.mxu1 %v237_v21  ;;  %149 = vmatprep.subr.bf16.mxu0 %v652_v0 }
  0x24   :  { %269 = vmatprep.subr.bf16.mxu1 %v652_v0 }
  0x26   :  { %150 = vmatpush2.bf16.msra.mxu0 %v627_v22 }
  0x27   :  { %270 = vmatpush2.bf16.msra.mxu1 %v628_v23  ;;  %361 = vmatprep.subr.bf16.mxu0 %v652_v0 }
  0x28   :  { %481 = vmatprep.subr.bf16.mxu1 %v652_v0 }
  0x29   :  { %152 = vmatmul.mubr.bf16.vlgmr.msra.gmra.mxu0 %v779_v24 }
  0x2a   :  { %272 = vmatmul.mubr.bf16.vlgmr.msra.gmra.mxu1 %v779_v24  ;;  %362 = vmatpush1.bf16.msra.mxu0 %v632_v25 }
  0x2b   :  { %482 = vmatpush1.bf16.msra.mxu1 %v633_v26  ;;  %363 = vmatprep.subr.bf16.mxu0 %v652_v0 }
  0x2c   :  { %483 = vmatprep.subr.bf16.mxu1 %v652_v0  ;;  %591 = vmatprep.mubr.msk.bf16.mxu0 %vm111_vm0, %v629_v13 }
  0x2d   :  { %602 = vmatprep.mubr.msk.bf16.mxu1 %vm111_vm0, %v629_v13 }
  0x2e   :  { %364 = vmatpush1.bf16.msra.mxu0 %v634_v28 }
  0x2f   :  { %484 = vmatpush1.bf16.msra.mxu1 %v635_v30  ;;  %365 = vmatprep.subr.bf16.mxu0 %v652_v0 }
  0x30   :  { %485 = vmatprep.subr.bf16.mxu1 %v652_v0 }
  0x32   :  { %366 = vmatpush1.bf16.msra.mxu0 %v636_v31 }
  0x33   :  { %486 = vmatpush1.bf16.msra.mxu1 %v637_v32  ;;  %367 = vmatprep.subr.bf16.mxu0 %v652_v0 }
  0x34   :  { %487 = vmatprep.subr.bf16.mxu1 %v652_v0 }
  0x36   :  { %368 = vmatpush1.bf16.msra.mxu0 %v638_v33 }
  0x37   :  { %488 = vmatpush1.bf16.msra.mxu1 %v639_v34  ;;  %369 = vmatprep.subr.bf16.mxu0 %v652_v0 }
  0x38   :  { %489 = vmatprep.subr.bf16.mxu1 %v652_v0 }
  0x3a   :  { %370 = vmatpush1.bf16.msra.mxu0 %v640_v35 }
  0x3b   :  { %490 = vmatpush1.bf16.msra.mxu1 %v641_v36  ;;  %371 = vmatprep.subr.bf16.mxu0 %v652_v0 }
  0x3c   :  { %491 = vmatprep.subr.bf16.mxu1 %v652_v0 }
  0x3e   :  { %372 = vmatpush1.bf16.msra.mxu0 %v642_v37 }
  0x3f   :  { %492 = vmatpush1.bf16.msra.mxu1 %v643_v38  ;;  %373 = vmatprep.subr.bf16.mxu0 %v652_v0 }
  0x40   :  { %493 = vmatprep.subr.bf16.mxu1 %v652_v0 }
  0x42   :  { %374 = vmatpush1.bf16.msra.mxu0 %v644_v39 }
  0x43   :  { %494 = vmatpush1.bf16.msra.mxu1 %v645_v40  ;;  %375 = vmatprep.subr.bf16.mxu0 %v652_v0 }
  0x44   :  { %495 = vmatprep.subr.bf16.mxu1 %v652_v0 }
  0x46   :  { %376 = vmatpush1.bf16.msra.mxu0 %v646_v41 }
  0x47   :  { %496 = vmatpush1.bf16.msra.mxu1 %v647_v42  ;;  %389 = vmatprep.subr.bf16.mxu0 %v652_v0 }
  0x48   :  { %509 = vmatprep.subr.bf16.mxu1 %v652_v0 }
  0x4a   :  { %390 = vmatpush2.bf16.msra.mxu0 %v359_v45 }
  0x4b   :  { %510 = vmatpush2.bf16.msra.mxu1 %v479_v46  ;;  %391 = vmatprep.subr.bf16.mxu0 %v652_v0 }
  0x4c   :  { %511 = vmatprep.subr.bf16.mxu1 %v652_v0 }
  0x4e   :  { %392 = vmatpush2.bf16.msra.mxu0 %v650_v47 }
  0x4f   :  { %512 = vmatpush2.bf16.msra.mxu1 %v651_v48 }
  0x51   :  { %394 = vmatmul.mubr.bf16.vlgmr.msra.gmra.mxu0 %v779_v24 }
  0x52   :  { %514 = vmatmul.mubr.bf16.vlgmr.msra.gmra.mxu1 %v779_v24 }
  0x87   :  { %v531_v62 = vpop.permute.xlu0 %530 }
  0x8b   :  { %v536_v10 = vpop.permute.xlu0 %535 }
  0xe9   :  { %v153_v49 = vpop.f32.mrf.mxu0 }
  0xea   :  { %v273_v50 = vpop.f32.mrf.mxu1 }
  0xeb   :  { %v155_v51 = vpop.f32.mrf.mxu0  ;;  %v280_v59 = vmax.f32 %v153_v49, %v273_v50 }
  0xec   :  { %v275_v52 = vpop.f32.mrf.mxu1 }
  0xed   :  { %v156_v53 = vpop.f32.mrf.mxu0 }
  0xee   :  { %v276_v54 = vpop.f32.mrf.mxu1 }
  0xef   :  { %v158_v55 = vpop.f32.mrf.mxu0  ;;  %v281_v3 = vmax.f32 %v156_v53, %v276_v54 }
  0xf0   :  { %v278_v56 = vpop.f32.mrf.mxu1 }
 0x111   :  { %v395_v57 = vpop.f32.mrf.mxu0 }
 0x112   :  { %v515_v58 = vpop.f32.mrf.mxu1 }
 0x113   :  { %v522_v60 = vmax.f32 %v395_v57, %v515_v58  ;;  %v397_v61 = vpop.f32.mrf.mxu0 }
 0x114   :  { %v517_v63 = vpop.f32.mrf.mxu1 }
 0x115   :  { %v524_v0 = vmax.f32 %v280_v59, %v522_v60  ;;  %v398_v1 = vpop.f32.mrf.mxu0 }
 0x116   :  { %v518_v2 = vpop.f32.mrf.mxu1 }
 0x117   :  { %v538_v4 = vadd.f32 %v531_v62, %v524_v0  ;;  %v523_v5 = vmax.f32 %v398_v1, %v518_v2  ;;  %v400_v6 = vpop.f32.mrf.mxu0 }
 0x118   :  { %v520_v7 = vpop.f32.mrf.mxu1 }
 0x119   :  { %v540_v8 = vmax.f32 %v538_v4, 0.0  ;;  %v525_v9 = vmax.f32 %v281_v3, %v523_v5 }
 0x11b   :  { %v605_v11 = vpack.c.bf16 %v540_v8, %v540_v8  ;;  %v539_v12 = vadd.f32 %v536_v10, %v525_v9 }
 0x11d   :  { %551 = vst.msk [vmem:[%s887_s6] sm:$0xf] %vm550_vm2, %v605_v11  ;;  %v541_v13 = vmax.f32 %v539_v12, 0.0 }
 0x11f   :  { %v606_v14 = vpack.c.bf16 %v541_v13, %v541_v13 }
 0x121   :  { %552 = vst.msk [vmem:[%s887_s6 + $0x4] sm:$0xf] %vm550_vm2, %v606_v14 }

// kernel: net_forward.5
= control target key start
LH: loop header
LB: loop body
LE: loop exit
PB: predicated region body
PF: predicated region fallthrough
CT: control target
= control target key end

     0   :  { %v1326_v0 = vmov 0   ;;  %vm493_vm0 = vcmask 130048   ;;  %vm838_vm1 = vcmask 982016   ;;  %vm857_vm2 = vcmask 1043456   ;;  %s1745_s0 = inlined_call_operand.vmem [shape: bf16[400,2], index: 0, kind: input, shape index: {}]   ;;  %s1746_s1 = inlined_call_operand.vmem [shape: bf16[120,400], index: 1, kind: input, shape index: {}]   ;;  %s1747_s2 = inlined_call_operand.vmem [shape: f32[120,1], index: 2, kind: input, shape index: {}]   ;;  %s1748_s4 = inlined_call_operand.vmem [shape: f32[84,1], index: 4, kind: input, shape index: {}]   ;;  %s1749_s6 = inlined_call_operand.vmem [shape: f32[10,1], index: 6, kind: input, shape index: {}]   ;;  %s1750_s3 = inlined_call_operand.vmem [shape: bf16[84,120], index: 3, kind: input, shape index: {}]   ;;  %s1751_s5 = inlined_call_operand.vmem [shape: bf16[10,84], index: 5, kind: input, shape index: {}]   ;;  %s1752_s7 = inlined_call_operand.vmem [shape: f32[10,2], index: 7, kind: output, shape index: {}]  }
   0x1   :  { %614 = vmatprep.subr.bf16.mxu1 %v1326_v0  ;;  %v1248_v1 = vld [vmem:[%s1745_s0 + $0x78] sm:$0xff]   ;;  %1247 = vset.pattern.permute.xlu1 %v1326_v0  ;;  %v1251_v4 = vld [vmem:[%s1745_s0 + $0x70] sm:$0xff]   ;;  %v1254_v7 = vld [vmem:[%s1745_s0 + $0x68] sm:$0xff]   ;;  %vm1328_vm3 = vmmov 0   ;;  %vm981_vm4 = vcmask 1041408   ;;  %vm977_vm5 = vcmask 687104  }
   0x2   :  { %v1249_v2 = vld [vmem:[%s1745_s0 + $0xb8] sm:$0xff]   ;;  %1246 = vset.pattern.permute.xlu0 %v1326_v0  ;;  %1113 = vmatprep.subr.bf16.mxu0 %v1248_v1  ;;  %v1252_v5 = vld [vmem:[%s1745_s0 + $0xb0] sm:$0xff]   ;;  %v1255_v8 = vld [vmem:[%s1745_s0 + $0xa8] sm:$0xff]   ;;  %vm1026_vm6 = vcmask 15360   ;;  %vm1028_vm7 = vcmask 9216  }
   0x3   :  { %v1250_v3 = vld [vmem:[%s1745_s0 + $0x38] sm:$0xff]   ;;  %615 = vmatpush1.bf16.msra.mxu1 %v1249_v2  ;;  %v1253_v6 = vld [vmem:[%s1745_s0 + $0x30] sm:$0xff]   ;;  %v1256_v9 = vld [vmem:[%s1745_s0 + $0x28] sm:$0xff]  }
   0x4   :  { %1114 = vmatpush3.bf16.msra.mxu0 %v1250_v3  ;;  %616 = vmatprep.subr.bf16.mxu1 %v1326_v0  ;;  %v1257_v10 = vld [vmem:[%s1745_s0 + $0x60] sm:$0xff]   ;;  %v1260_v13 = vld [vmem:[%s1745_s0 + $0x58] sm:$0xff]   ;;  %v1263_v16 = vld [vmem:[%s1745_s0 + $0x50] sm:$0xff]  }
   0x5   :  { %1115 = vmatprep.subr.bf16.mxu0 %v1251_v4  ;;  %v1258_v11 = vld [vmem:[%s1745_s0 + $0xa0] sm:$0xff]   ;;  %v1261_v14 = vld [vmem:[%s1745_s0 + $0x98] sm:$0xff]   ;;  %v1264_v17 = vld [vmem:[%s1745_s0 + $0x90] sm:$0xff]  }
   0x6   :  { %v1259_v12 = vld [vmem:[%s1745_s0 + $0x20] sm:$0xff]   ;;  %v1262_v15 = vld [vmem:[%s1745_s0 + $0x18] sm:$0xff]   ;;  %v1265_v18 = vld [vmem:[%s1745_s0 + $0x10] sm:$0xff]  }
   0x7   :  { %617 = vmatpush1.bf16.msra.mxu1 %v1252_v5  ;;  %v1266_v19 = vld [vmem:[%s1745_s0 + $0x48] sm:$0xff]   ;;  %v1269_v22 = vld [vmem:[%s1745_s0 + $0x40] sm:$0xff]   ;;  %v121_v35 = vld [vmem:[%s1747_s2 + $0x70] sm:$0xff] }
   0x8   :  { %1116 = vmatpush3.bf16.msra.mxu0 %v1253_v6  ;;  %618 = vmatprep.subr.bf16.mxu1 %v1326_v0  ;;  %v1267_v20 = vld [vmem:[%s1745_s0 + $0x88] sm:$0xff]   ;;  %v1274_v23 = vld [vmem:[%s1746_s1 + $0x4] ss:$16 sps:$4 sm:$0xff]   ;;  %v1272_v27 = vld [vmem:[%s1746_s1] ss:$16 sps:$4 sm:$0xff]  }
   0x9   :  { %1117 = vmatprep.subr.bf16.mxu0 %v1254_v7  ;;  %v1268_v21 = vld [vmem:[%s1745_s0 + $0x8] sm:$0xff]   ;;  %v1270_v24 = vld [vmem:[%s1745_s0 + $0x80] sm:$0xff]   ;;  %550 = vmatprep.mubr.bf16.mxu0 %v1274_v23  ;;  %v117_v39 = vld [vmem:[%s1747_s2 + $0x50] sm:$0xff] }
   0xa   :  { %v1278_v25 = vld [vmem:[%s1746_s1 + $0xc] ss:$16 sps:$4 sm:$0xff]   ;;  %v1271_v26 = vld [vmem:[%s1745_s0] sm:$0xff]   ;;  %v1276_v30 = vld [vmem:[%s1746_s1 + $0x8] ss:$16 sps:$4 sm:$0xff]   ;;  %194 = vperm.xlu0 %1246, %v121_v35  }
   0xb   :  { %619 = vmatpush1.bf16.msra.mxu1 %v1255_v8  ;;  %1091 = vmatprep.mubr.msk.bf16.mxu1 %vm493_vm0, %v1278_v25  ;;  %v1275_v28 = vld [vmem:[%s1745_s0 + $0xc0] sm:$0xff]   ;;  %v1282_v31 = vld [vmem:[%s1746_s1 + $0x2c] ss:$16 sps:$4 sm:$0xff]   ;;  %v1284_v34 = vld [vmem:[%s1746_s1 + $0x28] ss:$16 sps:$4 sm:$0xff]  }
   0xc   :  { %1118 = vmatpush3.bf16.msra.mxu0 %v1256_v9  ;;  %620 = vmatprep.subr.bf16.mxu1 %v1326_v0  ;;  %v1279_v29 = vld [vmem:[%s1746_s1 + $0x24] ss:$16 sps:$4 sm:$0xff]   ;;  %v1281_v32 = vld [vmem:[%s1746_s1 + $0x20] ss:$16 sps:$4 sm:$0xff]   ;;  %v120_v36 = vld [vmem:[%s1747_s2 + $0x68] sm:$0xff] }
   0xd   :  { %1119 = vmatprep.subr.bf16.mxu0 %v1257_v10  ;;  %v1285_v33 = vld [vmem:[%s1746_s1 + $0x44] ss:$16 sps:$4 sm:$0xff]   ;;  %v1288_v37 = vld [vmem:[%s1746_s1 + $0x4c] ss:$16 sps:$4 sm:$0xff]   ;;  %189 = vperm.xlu1 %1247, %v120_v36   ;;  %v1287_v40 = vld [vmem:[%s1746_s1 + $0x40] ss:$16 sps:$4 sm:$0xff]  }
   0xe   :  { %v119_v38 = vld [vmem:[%s1747_s2 + $0x60] sm:$0xff]  ;;  %v118_v42 = vld [vmem:[%s1747_s2 + $0x58] sm:$0xff]  ;;  %v116_v46 = vld [vmem:[%s1747_s2 + $0x48] sm:$0xff] }
   0xf   :  { %621 = vmatpush1.bf16.msra.mxu1 %v1258_v11  ;;  %184 = vperm.xlu0 %1246, %v119_v38   ;;  %v1291_v41 = vld [vmem:[%s1746_s1 + $0x64] ss:$16 sps:$4 sm:$0xff]   ;;  %v1290_v44 = vld [vmem:[%s1746_s1 + $0x48] ss:$16 sps:$4 sm:$0xff]   ;;  %v1294_v45 = vld [vmem:[%s1746_s1 + $0x6c] ss:$16 sps:$4 sm:$0xff]  }
  0x10   :  { %1120 = vmatpush3.bf16.msra.mxu0 %v1259_v12  ;;  %622 = vmatprep.subr.bf16.mxu1 %v1326_v0  ;;  %v115_v43 = vld [vmem:[%s1747_s2 + $0x40] sm:$0xff]  ;;  %v113_v47 = vld [vmem:[%s1747_s2 + $0x30] sm:$0xff]  ;;  %v114_v50 = vld [vmem:[%s1747_s2 + $0x38] sm:$0xff] }
  0x11   :  { %1121 = vmatprep.subr.bf16.mxu0 %v1260_v13  ;;  %174 = vperm.xlu1 %1247, %v117_v39   ;;  %v1293_v48 = vld [vmem:[%s1746_s1 + $0x60] ss:$16 sps:$4 sm:$0xff]   ;;  %v1297_v49 = vld [vmem:[%s1746_s1 + $0x84] ss:$16 sps:$4 sm:$0xff]   ;;  %v1296_v52 = vld [vmem:[%s1746_s1 + $0x68] ss:$16 sps:$4 sm:$0xff]  }
  0x12   :  { %v111_v51 = vld [vmem:[%s1747_s2 + $0x20] sm:$0xff]  ;;  %v1300_v53 = vld [vmem:[%s1746_s1 + $0x8c] ss:$16 sps:$4 sm:$0xff]   ;;  %v109_v55 = vld [vmem:[%s1747_s2 + $0x10] sm:$0xff] }
  0x13   :  { %623 = vmatpush1.bf16.msra.mxu1 %v1261_v14  ;;  %179 = vperm.xlu0 %1246, %v118_v42   ;;  %v112_v54 = vld [vmem:[%s1747_s2 + $0x28] sm:$0xff]  ;;  %v1299_v56 = vld [vmem:[%s1746_s1 + $0x80] ss:$16 sps:$4 sm:$0xff]   ;;  %v1303_v57 = vld [vmem:[%s1746_s1 + $0xa4] ss:$16 sps:$4 sm:$0xff]  }
  0x14   :  { %1122 = vmatpush3.bf16.msra.mxu0 %v1262_v15  ;;  %624 = vmatprep.subr.bf16.mxu1 %v1326_v0  ;;  %v110_v58 = vld [vmem:[%s1747_s2 + $0x18] sm:$0xff]  ;;  %v107_v59 = vld [vmem:[%s1747_s2] sm:$0xff]  ;;  %v108_v62 = vld [vmem:[%s1747_s2 + $0x8] sm:$0xff] }
  0x15   :  { %1123 = vmatprep.subr.bf16.mxu0 %v1263_v16  ;;  %164 = vperm.xlu1 %1247, %v115_v43   ;;  %v1302_v60 = vld [vmem:[%s1746_s1 + $0x88] ss:$16 sps:$4 sm:$0xff]   ;;  %v1306_v61 = vld [vmem:[%s1746_s1 + $0xac] ss:$16 sps:$4 sm:$0xff]   ;;  %v754_v63 = vld [vmem:[%s1748_s4 + $0x50] sm:$0xf] }
  0x16   :  { %v1309_v1 = vld [vmem:[%s1746_s1 + $0xc4] ss:$16 sps:$4 sm:$0xff]   ;;  %v753_v3 = vld [vmem:[%s1748_s4 + $0x48] sm:$0xff]  ;;  %v751_v8 = vld [vmem:[%s1748_s4 + $0x38] sm:$0xff] }
  0x17   :  { %625 = vmatpush1.bf16.msra.mxu1 %v1264_v17  ;;  %169 = vperm.xlu0 %1246, %v116_v46   ;;  %v752_v2 = vld [vmem:[%s1748_s4 + $0x40] sm:$0xff]  ;;  %v1308_v4 = vld [vmem:[%s1746_s1 + $0xa8] ss:$16 sps:$4 sm:$0xff]   ;;  %v1312_v5 = vld [vmem:[%s1746_s1 + $0xcc] ss:$16 sps:$4 sm:$0xff]  }
  0x18   :  { %1124 = vmatpush3.bf16.msra.mxu0 %v1265_v18  ;;  %626 = vmatprep.subr.bf16.mxu1 %v1326_v0  ;;  %v750_v6 = vld [vmem:[%s1748_s4 + $0x30] sm:$0xff]  ;;  %v55_v7 = vld [vmem:[%s1746_s1 + $0xe0] sm:$0xff]  ;;  %v56_v11 = vld [vmem:[%s1746_s1 + $0xe8] sm:$0xff] }
  0x19   :  { %1125 = vmatprep.subr.bf16.mxu0 %v1266_v19  ;;  %154 = vperm.xlu1 %1247, %v113_v47   ;;  %v1311_v9 = vld [vmem:[%s1746_s1 + $0xc0] ss:$16 sps:$4 sm:$0xff]   ;;  %v1063_v10 = vcombine.high %v55_v7, %v55_v7  ;;  %v749_v13 = vld [vmem:[%s1748_s4 + $0x28] sm:$0xff]  ;;  %v1065_v15 = vcombine.high %v56_v11, %v56_v11  ;;  %v747_v17 = vld [vmem:[%s1748_s4 + $0x18] sm:$0xff]  ;;  %v1062_v18 = vcombine.low %v55_v7, %v55_v7 }
  0x1a   :  { %v748_v12 = vld [vmem:[%s1748_s4 + $0x20] sm:$0xff]  ;;  %v1314_v14 = vld [vmem:[%s1746_s1 + $0xc8] ss:$16 sps:$4 sm:$0xff]   ;;  %v746_v16 = vld [vmem:[%s1748_s4 + $0x10] sm:$0xff] }
  0x1b   :  { %627 = vmatpush1.bf16.msra.mxu1 %v1267_v20  ;;  %159 = vperm.xlu0 %1246, %v114_v50   ;;  %v744_v19 = vld [vmem:[%s1748_s4] sm:$0xff]  ;;  %v745_v20 = vld [vmem:[%s1748_s4 + $0x8] sm:$0xff] }
  0x1c   :  { %1126 = vmatpush3.bf16.msra.mxu0 %v1268_v21  ;;  %628 = vmatprep.subr.bf16.mxu1 %v1326_v0  ;;  %v1064_v21 = vcombine.low %v56_v11, %v56_v11  ;;  %v961_v23 = vld [vmem:[%s1749_s6 + $0x8] sm:$0x3] }
  0x1d   :  { %1127 = vmatprep.subr.bf16.mxu0 %v1269_v22  ;;  %144 = vperm.xlu1 %1247, %v111_v51   ;;  %v960_v22 = vld [vmem:[%s1749_s6] sm:$0xff] }
  0x1f   :  { %629 = vmatpush1.bf16.msra.mxu1 %v1270_v24  ;;  %149 = vperm.xlu0 %1246, %v112_v54  }
  0x20   :  { %1128 = vmatpush3.bf16.msra.mxu0 %v1271_v26  ;;  %644 = vmatprep.subr.bf16.mxu1 %v1326_v0  ;;  %v1305_v0 = vld [vmem:[%s1746_s1 + $0xa0] ss:$16 sps:$4 sm:$0xff]  }
  0x21   :  { %134 = vperm.xlu1 %1247, %v109_v55  }
  0x23   :  { %551 = vmatmul.mubr.bf16.vlgmr.msra.gmra.mxu0 %v1272_v27  ;;  %645 = vmatpush2.bf16.msra.mxu1 %v1275_v28  ;;  %v1319_v27 = vld [vmem:[%s1750_s3] sm:$0xff]  }
  0x24   :  { %558 = vmatprep.mubr.bf16.mxu0 %v1279_v29  ;;  %139 = vperm.xlu0 %1246, %v110_v58  }
  0x25   :  { %124 = vperm.xlu1 %1247, %v107_v59  }
  0x26   :  { %647 = vmatmul.mubr.bf16.vlgmr.msra.gmra.mxu1 %v1276_v30 }
  0x27   :  { %1092 = vmatprep.mubr.msk.bf16.mxu1 %vm493_vm0, %v1282_v31 }
  0x28   :  { %129 = vperm.xlu0 %1246, %v108_v62  }
  0x29   :  { %807 = vperm.xlu1 %1247, %v754_v63  }
  0x2b   :  { %559 = vmatmul.mubr.bf16.gmra.mxu0 %v1281_v32 }
  0x2c   :  { %566 = vmatprep.mubr.bf16.mxu0 %v1285_v33  ;;  %797 = vperm.xlu0 %1246, %v752_v2  }
  0x2d   :  { %802 = vperm.xlu1 %1247, %v753_v3  }
  0x2e   :  { %655 = vmatmul.mubr.bf16.gmra.mxu1 %v1284_v34 }
  0x2f   :  { %1093 = vmatprep.mubr.msk.bf16.mxu1 %vm493_vm0, %v1288_v37 }
  0x30   :  { %787 = vperm.xlu0 %1246, %v750_v6  }
  0x31   :  { %792 = vperm.xlu1 %1247, %v751_v8  }
  0x33   :  { %567 = vmatmul.mubr.bf16.gmra.mxu0 %v1287_v40 }
  0x34   :  { %574 = vmatprep.mubr.bf16.mxu0 %v1291_v41  ;;  %777 = vperm.xlu0 %1246, %v748_v12  }
  0x35   :  { %782 = vperm.xlu1 %1247, %v749_v13  }
  0x36   :  { %663 = vmatmul.mubr.bf16.gmra.mxu1 %v1290_v44 }
  0x37   :  { %1094 = vmatprep.mubr.msk.bf16.mxu1 %vm493_vm0, %v1294_v45 }
  0x38   :  { %767 = vperm.xlu0 %1246, %v746_v16  }
  0x39   :  { %772 = vperm.xlu1 %1247, %v747_v17  }
  0x3b   :  { %575 = vmatmul.mubr.bf16.gmra.mxu0 %v1293_v48 }
  0x3c   :  { %582 = vmatprep.mubr.bf16.mxu0 %v1297_v49  ;;  %757 = vperm.xlu0 %1246, %v744_v19  }
  0x3d   :  { %762 = vperm.xlu1 %1247, %v745_v20  }
  0x3e   :  { %671 = vmatmul.mubr.bf16.gmra.mxu1 %v1296_v52 }
  0x3f   :  { %1095 = vmatprep.mubr.msk.bf16.mxu1 %vm493_vm0, %v1300_v53 }
  0x40   :  { %964 = vperm.xlu0 %1246, %v960_v22  }
  0x41   :  { %969 = vperm.xlu1 %1247, %v961_v23  }
  0x43   :  { %583 = vmatmul.mubr.bf16.gmra.mxu0 %v1299_v56 }
  0x44   :  { %590 = vmatprep.mubr.bf16.mxu0 %v1303_v57 }
  0x46   :  { %679 = vmatmul.mubr.bf16.gmra.mxu1 %v1302_v60 }
  0x47   :  { %1096 = vmatprep.mubr.msk.bf16.mxu1 %vm493_vm0, %v1306_v61 }
  0x4b   :  { %591 = vmatmul.mubr.bf16.gmra.mxu0 %v1305_v0 }
  0x4c   :  { %598 = vmatprep.mubr.bf16.mxu0 %v1309_v1 }
  0x4e   :  { %687 = vmatmul.mubr.bf16.gmra.mxu1 %v1308_v4 }
  0x4f   :  { %1097 = vmatprep.mubr.msk.bf16.mxu1 %vm493_vm0, %v1312_v5 }
  0x53   :  { %599 = vmatmul.mubr.bf16.gmra.mxu0 %v1311_v9 }
  0x54   :  { %606 = vmatprep.mubr.bf16.mxu0 %v1063_v10 }
  0x56   :  { %695 = vmatmul.mubr.bf16.gmra.mxu1 %v1314_v14 }
  0x57   :  { %1098 = vmatprep.mubr.msk.bf16.mxu1 %vm493_vm0, %v1065_v15 }
  0x5b   :  { %607 = vmatmul.mubr.bf16.gmra.mxu0 %v1062_v18 }
  0x5c   :  { %1214 = vmatprep.mubr.msk.bf16.mxu0 %vm838_vm1, %v1319_v27 }
  0x5e   :  { %703 = vmatmul.mubr.bf16.gmra.mxu1 %v1064_v21 }
  0x85   :  { %v1637_v24 = vpop.permute.xlu0 %194 }
  0x88   :  { %v1639_v25 = vpop.permute.xlu1 %189 }
  0x8a   :  { %v1641_v26 = vpop.permute.xlu0 %184 }
  0x8c   :  { %v1646_v28 = vpop.permute.xlu1 %174 }
  0x8e   :  { %v1649_v29 = vpop.permute.xlu0 %179 }
  0x90   :  { %v1651_v30 = vpop.permute.xlu1 %164 }
  0x92   :  { %v1653_v31 = vpop.permute.xlu0 %169 }
  0x94   :  { %v1655_v32 = vpop.permute.xlu1 %154 }
  0x96   :  { %v1657_v33 = vpop.permute.xlu0 %159 }
  0x98   :  { %v1659_v34 = vpop.permute.xlu1 %144 }
  0x9a   :  { %v1661_v35 = vpop.permute.xlu0 %149 }
  0x9c   :  { %v135_v36 = vpop.permute.xlu1 %134 }
  0x9f   :  { %v140_v38 = vpop.permute.xlu0 %139 }
  0xa0   :  { %v125_v40 = vpop.permute.xlu1 %124 }
  0xa3   :  { %v130_v47 = vpop.permute.xlu0 %129 }
  0xe3   :  { %v1129_v37 = vpop.f32.mrf.mxu0 }
  0xe5   :  { %v1130_v39 = vpop.f32.mrf.mxu0 }
  0xe6   :  { %v1131_v41 = vadd.f32 %v1130_v39, %v1129_v37  ;;  %v648_v42 = vpop.f32.mrf.mxu1 }
  0xe7   :  { %v1132_v43 = vpop.f32.mrf.mxu0 }
  0xe8   :  { %v553_v44 = vadd.f32 %v1131_v41, %v125_v40  ;;  %v650_v45 = vpop.f32.mrf.mxu1 }
  0xe9   :  { %v1133_v46 = vpop.f32.mrf.mxu0 }
  0xea   :  { %v649_v48 = vadd.f32 %v648_v42, %v553_v44  ;;  %v1134_v49 = vadd.f32 %v1133_v46, %v1132_v43  ;;  %v651_v50 = vpop.f32.mrf.mxu1 }
  0xeb   :  { %v1135_v51 = vpop.f32.mrf.mxu0 }
  0xec   :  { %v556_v52 = vadd.f32 %v1134_v49, %v130_v47  ;;  %v653_v53 = vpop.f32.mrf.mxu1  ;;  %v710_v59 = vmax.f32 %v649_v48, 0.0 }
  0xed   :  { %v1136_v54 = vpop.f32.mrf.mxu0 }
  0xee   :  { %v652_v55 = vadd.f32 %v651_v50, %v556_v52  ;;  %v1137_v56 = vadd.f32 %v1136_v54, %v1135_v51  ;;  %v656_v57 = vpop.f32.mrf.mxu1 }
  0xef   :  { %v1138_v58 = vpop.f32.mrf.mxu0 }
  0xf0   :  { %v711_v60 = vmax.f32 %v652_v55, 0.0  ;;  %v561_v61 = vadd.f32 %v1137_v56, %v135_v36  ;;  %v658_v62 = vpop.f32.mrf.mxu1 }
  0xf1   :  { %v1139_v63 = vpop.f32.mrf.mxu0 }
  0xf2   :  { %v657_v0 = vadd.f32 %v656_v57, %v561_v61  ;;  %v1140_v1 = vadd.f32 %v1139_v63, %v1138_v58  ;;  %v659_v2 = vpop.f32.mrf.mxu1  ;;  %v1663_v3 = vpack.c.bf16 %v711_v60, %v710_v59 }
  0xf3   :  { %v1665_v4 = vpop.f32.mrf.mxu0 }
  0xf4   :  { %v564_v5 = vadd.f32 %v1140_v1, %v140_v38  ;;  %v661_v6 = vpop.f32.mrf.mxu1  ;;  %v712_v11 = vmax.f32 %v657_v0, 0.0 }
  0xf5   :  { %v1667_v7 = vpop.f32.mrf.mxu0 }
  0xf6   :  { %v660_v8 = vadd.f32 %v659_v2, %v564_v5  ;;  %v1669_v9 = vpop.f32.mrf.mxu1 }
  0xf7   :  { %v1671_v10 = vpop.f32.mrf.mxu0 }
  0xf8   :  { %v713_v12 = vmax.f32 %v660_v8, 0.0  ;;  %v666_v13 = vpop.f32.mrf.mxu1 }
  0xf9   :  { %v1673_v14 = vpop.f32.mrf.mxu0 }
  0xfa   :  { %v1675_v15 = vpack.c.bf16 %v713_v12, %v712_v11  ;;  %v1677_v16 = vpop.f32.mrf.mxu1 }
  0xfb   :  { %v1147_v17 = vpop.f32.mrf.mxu0 }
  0xfc   :  { %v669_v18 = vpop.f32.mrf.mxu1 }
  0xfd   :  { %v1148_v19 = vpop.f32.mrf.mxu0 }
  0xfe   :  { %v1679_v20 = vpop.f32.mrf.mxu1 }
  0xff   :  { %v1150_v21 = vpop.f32.mrf.mxu0 }
 0x100   :  { %v674_v22 = vpop.f32.mrf.mxu1 }
 0x101   :  { %v1151_v23 = vpop.f32.mrf.mxu0 }
 0x102   :  { %v1681_v27 = vpop.f32.mrf.mxu1 }
 0x103   :  { %v1153_v36 = vpop.f32.mrf.mxu0 }
 0x104   :  { %v677_v37 = vpop.f32.mrf.mxu1 }
 0x105   :  { %v1154_v38 = vpop.f32.mrf.mxu0 }
 0x106   :  { %v1683_v39 = vpop.f32.mrf.mxu1 }
 0x107   :  { %v1156_v40 = vpop.f32.mrf.mxu0 }
 0x108   :  { %v682_v41 = vpop.f32.mrf.mxu1 }
 0x109   :  { %v1157_v42 = vpop.f32.mrf.mxu0 }
 0x10a   :  { %v683_v43 = vpop.f32.mrf.mxu1  ;;  %v1158_v13 = vadd.f32 %v1157_v42, %v1156_v40  ;;  %v1149_v42 = vadd.f32 %v1148_v19, %v1147_v17  ;;  %v1143_v17 = vadd.f32 %v1667_v7, %v1665_v4 }
 0x10b   :  { %v1159_v44 = vpop.f32.mrf.mxu0 }
 0x10c   :  { %v685_v45 = vpop.f32.mrf.mxu1  ;;  %v577_v19 = vadd.f32 %v1149_v42, %v1655_v32 }
 0x10d   :  { %v1160_v46 = vpop.f32.mrf.mxu0 }
 0x10e   :  { %v688_v47 = vpop.f32.mrf.mxu1  ;;  %v1161_v5 = vadd.f32 %v1160_v46, %v1159_v44  ;;  %v1152_v44 = vadd.f32 %v1151_v23, %v1150_v21 }
 0x10f   :  { %v1162_v48 = vpop.f32.mrf.mxu0 }
 0x110   :  { %v690_v49 = vpop.f32.mrf.mxu1 }
 0x111   :  { %v1163_v50 = vpop.f32.mrf.mxu0  ;;  %v1155_v49 = vadd.f32 %v1154_v38, %v1153_v36  ;;  %v580_v36 = vadd.f32 %v1152_v44, %v1657_v33 }
 0x112   :  { %v691_v51 = vpop.f32.mrf.mxu1  ;;  %v1164_v63 = vadd.f32 %v1163_v50, %v1162_v48  ;;  %v593_v48 = vadd.f32 %v1161_v5, %v1646_v28  ;;  %v1146_v28 = vadd.f32 %v1673_v14, %v1671_v10 }
 0x113   :  { %v1165_v52 = vpop.f32.mrf.mxu0  ;;  %v676_v10 = vadd.f32 %v1681_v27, %v580_v36 }
 0x114   :  { %v693_v53 = vpop.f32.mrf.mxu1  ;;  %v596_v18 = vadd.f32 %v1164_v63, %v1649_v29  ;;  %v585_v29 = vadd.f32 %v1155_v49, %v1651_v30 }
 0x115   :  { %v1166_v54 = vpop.f32.mrf.mxu0  ;;  %v717_v32 = vmax.f32 %v676_v10, 0.0 }
 0x116   :  { %v696_v55 = vpop.f32.mrf.mxu1  ;;  %v1167_v59 = vadd.f32 %v1166_v54, %v1165_v52  ;;  %v692_v46 = vadd.f32 %v691_v51, %v596_v18  ;;  %v681_v30 = vadd.f32 %v1683_v39, %v585_v29  ;;  %v572_v51 = vadd.f32 %v1146_v28, %v1661_v35 }
 0x117   :  { %v1168_v56 = vpop.f32.mrf.mxu0 }
 0x118   :  { %v698_v57 = vpop.f32.mrf.mxu1  ;;  %v601_v6 = vadd.f32 %v1167_v59, %v1641_v26  ;;  %v588_v26 = vadd.f32 %v1158_v13, %v1653_v31  ;;  %v721_v21 = vmax.f32 %v692_v46, 0.0  ;;  %v668_v4 = vadd.f32 %v1677_v16, %v572_v51  ;;  %v1323_v16 = vld [vmem:[%s1750_s3 + $0x20] sm:$0xff]  }
 0x119   :  { %v1169_v58 = vpop.f32.mrf.mxu0 }
 0x11a   :  { %v1170_v60 = vadd.f32 %v1169_v58, %v1168_v56  ;;  %v699_v61 = vpop.f32.mrf.mxu1  ;;  %v684_v38 = vadd.f32 %v683_v43, %v588_v26  ;;  %v569_v43 = vadd.f32 %v1143_v17, %v1659_v34  ;;  %v718_v58 = vmax.f32 %v681_v30, 0.0  ;;  %v1320_v34 = vld [vmem:[%s1750_s3 + $0x8] sm:$0xff]  }
 0x11b   :  { %v1171_v62 = vpop.f32.mrf.mxu0  ;;  %v715_v35 = vmax.f32 %v668_v4, 0.0 }
 0x11c   :  { %v604_v0 = vadd.f32 %v1170_v60, %v1639_v25  ;;  %v701_v1 = vpop.f32.mrf.mxu1  ;;  %v697_v25 = vadd.f32 %v696_v55, %v601_v6  ;;  %v719_v33 = vmax.f32 %v684_v38, 0.0  ;;  %v673_v55 = vadd.f32 %v1679_v20, %v577_v19 }
 0x11d   :  { %v1172_v2 = vpop.f32.mrf.mxu0  ;;  %v665_v39 = vadd.f32 %v1669_v9, %v569_v43  ;;  %v1321_v9 = vld [vmem:[%s1750_s3 + $0x10] sm:$0xff]   ;;  %v1327_v20 = vmov 0.0  }
 0x11e   :  { %v1173_v8 = vadd.f32 %v1172_v2, %v1171_v62  ;;  %v704_v11 = vpop.f32.mrf.mxu1  ;;  %v700_v22 = vadd.f32 %v699_v61, %v604_v0  ;;  %v722_v56 = vmax.f32 %v697_v25, 0.0  ;;  %v740_v7 = vpack.c.bf16 %v719_v33, %v718_v58  ;;  %1226 = vmatprep.subr.bf16.mxu1 %v1327_v20  ;;  %1238 = vmatprep.mubr.msk.bf16.mxu1 %vm1328_vm3, %v1327_v20  ;;  %v808_v0 = vpop.permute.xlu1 %807 }
 0x11f   :  { %v1174_v12 = vpop.f32.mrf.mxu0  ;;  %v716_v59 = vmax.f32 %v673_v55, 0.0  ;;  %v714_v60 = vmax.f32 %v665_v39, 0.0  ;;  %v1325_v39 = vld [vmem:[%s1751_s5] sm:$0x1f]  }
 0x120   :  { %v609_v37 = vadd.f32 %v1173_v8, %v1637_v24  ;;  %v706_v41 = vpop.f32.mrf.mxu1  ;;  %v723_v53 = vmax.f32 %v700_v22, 0.0  ;;  %v689_v24 = vadd.f32 %v688_v47, %v593_v48 }
 0x121   :  { %v1175_v45 = vpop.f32.mrf.mxu0  ;;  %v739_v27 = vpack.c.bf16 %v717_v32, %v716_v59  ;;  %v738_v61 = vpack.c.bf16 %v715_v35, %v714_v60 }
 0x122   :  { %v705_v50 = vadd.f32 %v704_v11, %v609_v37  ;;  %v707_v52 = vpop.f32.mrf.mxu1  ;;  %v742_v23 = vpack.c.bf16 %v723_v53, %v722_v56  ;;  %v720_v47 = vmax.f32 %v689_v24, 0.0  ;;  %v803_v6 = vpop.permute.xlu1 %802 }
 0x123   :  { %v798_v11 = vpop.permute.xlu0 %797 }
 0x124   :  { %v724_v54 = vmax.f32 %v705_v50, 0.0  ;;  %v708_v40 = vpop.f32.mrf.mxu1  ;;  %v741_v14 = vpack.c.bf16 %v721_v21, %v720_v47 }
 0x126   :  { %v743_v57 = vpack.c.bf16 %v724_v54, %v724_v54  ;;  %v793_v18 = vpop.permute.xlu1 %792 }
 0x127   :  { %v788_v41 = vpop.permute.xlu0 %787 }
 0x128   :  { %1242 = vmatprep.subr.msk.bf16.mxu0 %vm857_vm2, %v743_v57  ;;  %v859_v31 = vsel %vm857_vm2, %v743_v57, 0 }
 0x129   :  { %1199 = vmatpush3.bf16.msra.mxu0 %v859_v31 }
 0x12a   :  { %1200 = vmatprep.subr.bf16.mxu0 %v742_v23  ;;  %v783_v52 = vpop.permute.xlu1 %782 }
 0x12b   :  { %v778_v54 = vpop.permute.xlu0 %777 }
 0x12d   :  { %1201 = vmatpush3.bf16.msra.mxu0 %v742_v23 }
 0x12e   :  { %1202 = vmatprep.subr.bf16.mxu0 %v741_v14  ;;  %v773_v28 = vpop.permute.xlu1 %772 }
 0x12f   :  { %v768_v21 = vpop.permute.xlu0 %767 }
 0x131   :  { %1203 = vmatpush3.bf16.msra.mxu0 %v741_v14 }
 0x132   :  { %1204 = vmatprep.subr.bf16.mxu0 %v740_v7  ;;  %v763_v47 = vpop.permute.xlu1 %762 }
 0x133   :  { %v758_v14 = vpop.permute.xlu0 %757 }
 0x135   :  { %1205 = vmatpush3.bf16.msra.mxu0 %v740_v7 }
 0x136   :  { %1206 = vmatprep.subr.bf16.mxu0 %v739_v27 }
 0x137   :  { %v965_v59 = vpop.permute.xlu0 %964 }
 0x139   :  { %1207 = vmatpush3.bf16.msra.mxu0 %v739_v27 }
 0x13a   :  { %1208 = vmatprep.subr.bf16.mxu0 %v738_v61 }
 0x13d   :  { %1209 = vmatpush3.bf16.msra.mxu0 %v738_v61  ;;  %v970_v61 = vpop.permute.xlu1 %969 }
 0x13e   :  { %1210 = vmatprep.subr.bf16.mxu0 %v1675_v15 }
 0x141   :  { %1211 = vmatpush3.bf16.msra.mxu0 %v1675_v15  ;;  %v1322_v15 = vld [vmem:[%s1750_s3 + $0x18] sm:$0xff]  }
 0x142   :  { %1212 = vmatprep.subr.bf16.mxu0 %v1663_v3 }
 0x145   :  { %1213 = vmatpush3.bf16.msra.mxu0 %v1663_v3  ;;  %v1324_v3 = vld [vmem:[%s1750_s3 + $0x28] ss:$0 sps:$4 sm:$0x33]  }
 0x148   :  { %1215 = vmatmul.mubr.msk.bf16.vlgmr.msra.gmra.mxu0 %vm838_vm1, %v1320_v34 }
 0x149   :  { %1218 = vmatprep.mubr.msk.bf16.mxu0 %vm838_vm1, %v1321_v9 }
 0x150   :  { %1219 = vmatmul.mubr.msk.bf16.gmra.mxu0 %vm838_vm1, %v1322_v15 }
 0x151   :  { %1222 = vmatprep.mubr.msk.bf16.mxu0 %vm838_vm1, %v1323_v16 }
 0x158   :  { %1223 = vmatmul.mubr.msk.bf16.gmra.mxu0 %vm838_vm1, %v1324_v3 }
 0x208   :  { %v1216_v62 = vpop.f32.mrf.mxu0 }
 0x209   :  { %v904_v19 = vadd.f32 %v1216_v62, %v768_v21 }
 0x20a   :  { %v895_v63 = vpop.f32.mrf.mxu0 }
 0x20b   :  { %v943_v43 = vmax.f32 %v904_v19, 0.0  ;;  %v896_v55 = vadd.f32 %v895_v63, %v758_v14 }
 0x20c   :  { %v1217_v1 = vpop.f32.mrf.mxu0 }
 0x20d   :  { %v907_v23 = vadd.f32 %v1217_v1, %v773_v28  ;;  %v941_v32 = vmax.f32 %v896_v55, 0.0 }
 0x20e   :  { %v898_v2 = vpop.f32.mrf.mxu0 }
 0x20f   :  { %v944_v51 = vmax.f32 %v907_v23, 0.0  ;;  %v899_v10 = vadd.f32 %v898_v2, %v763_v47 }
 0x210   :  { %v1220_v5 = vpop.f32.mrf.mxu0 }
 0x211   :  { %v920_v40 = vadd.f32 %v1220_v5, %v788_v41  ;;  %v955_v58 = vpack.c.bf16 %v944_v51, %v943_v43  ;;  %v942_v4 = vmax.f32 %v899_v10, 0.0 }
 0x212   :  { %v911_v8 = vpop.f32.mrf.mxu0 }
 0x213   :  { %v947_v36 = vmax.f32 %v920_v40, 0.0  ;;  %v912_v38 = vadd.f32 %v911_v8, %v778_v54  ;;  %v954_v7 = vpack.c.bf16 %v942_v4, %v941_v32 }
 0x214   :  { %v1221_v12 = vpop.f32.mrf.mxu0 }
 0x215   :  { %v923_v26 = vadd.f32 %v1221_v12, %v793_v18  ;;  %v945_v30 = vmax.f32 %v912_v38, 0.0 }
 0x216   :  { %v914_v13 = vpop.f32.mrf.mxu0 }
 0x217   :  { %v948_v24 = vmax.f32 %v923_v26, 0.0  ;;  %v915_v56 = vadd.f32 %v914_v13, %v783_v52 }
 0x218   :  { %v1224_v22 = vpop.f32.mrf.mxu0 }
 0x219   :  { %v936_v37 = vadd.f32 %v1224_v22, %v808_v0  ;;  %v957_v31 = vpack.c.bf16 %v948_v24, %v947_v36  ;;  %v946_v17 = vmax.f32 %v915_v56, 0.0 }
 0x21a   :  { %v927_v45 = vpop.f32.mrf.mxu0 }
 0x21b   :  { %v951_v49 = vmax.f32 %v936_v37, 0.0  ;;  %v928_v50 = vadd.f32 %v927_v45, %v798_v11  ;;  %v956_v33 = vpack.c.bf16 %v946_v17, %v945_v30 }
 0x21c   :  { %v1225_v48 = vpop.f32.mrf.mxu0 }
 0x21d   :  { %v959_v25 = vpack.c.bf16 %v951_v49, %v951_v49  ;;  %v949_v42 = vmax.f32 %v928_v50, 0.0 }
 0x21e   :  { %v930_v44 = vpop.f32.mrf.mxu0 }
 0x21f   :  { %v931_v46 = vadd.f32 %v930_v44, %v803_v6  ;;  %v983_v53 = vsel %vm981_vm4, %v959_v25, 0 }
 0x220   :  { %1227 = vmatpush3.bf16.msra.mxu1 %v983_v53 }
 0x221   :  { %v950_v29 = vmax.f32 %v931_v46, 0.0  ;;  %1228 = vmatprep.subr.bf16.mxu1 %v1327_v20 }
 0x223   :  { %v958_v57 = vpack.c.bf16 %v950_v29, %v949_v42 }
 0x225   :  { %1229 = vmatpush3.bf16.msra.mxu1 %v958_v57 }
 0x226   :  { %1230 = vmatprep.subr.bf16.mxu1 %v1327_v20 }
 0x229   :  { %1231 = vmatpush3.bf16.msra.mxu1 %v957_v31 }
 0x22a   :  { %1232 = vmatprep.subr.bf16.mxu1 %v1327_v20 }
 0x22d   :  { %1233 = vmatpush3.bf16.msra.mxu1 %v956_v33 }
 0x22e   :  { %1234 = vmatprep.subr.bf16.mxu1 %v1327_v20 }
 0x231   :  { %1235 = vmatpush3.bf16.msra.mxu1 %v955_v58 }
 0x232   :  { %1236 = vmatprep.subr.bf16.mxu1 %v1327_v20 }
 0x235   :  { %1237 = vmatpush3.bf16.msra.mxu1 %v954_v7 }
 0x238   :  { %1239 = vmatmul.mubr.msk.bf16.vlgmr.msra.gmra.mxu1 %vm977_vm5, %v1325_v39 }
 0x2f8   :  { %v1019_v35 = vpop.f32.mrf.mxu1 }
 0x2f9   :  { %v1020_v27 = vadd.f32 %v1019_v35, %v965_v59 }
 0x2fa   :  { %v1240_v60 = vpop.f32.mrf.mxu1 }
 0x2fb   :  { %1027 = vst.msk [vmem:[%s1752_s7] sm:$0xff] %vm1026_vm6, %v1020_v27 }
 0x2fc   :  { %v1022_v34 = vpop.f32.mrf.mxu1 }
 0x2fd   :  { %v1023_v9 = vadd.f32 %v1022_v34, %v970_v61 }
 0x2fe   :  { %v1241_v15 = vpop.f32.mrf.mxu1 }
 0x2ff   :  { %1029 = vst.msk [vmem:[%s1752_s7 + $0x8] sm:$0x3] %vm1028_vm7, %v1023_v9 }

</bundles_post_ra>
